<compile_context>
chip_gen: v5e
topology: v5e:2x2
jax: 0.10.0
libtpu: 0.0.40
codegen_flags: <defaults>
</compile_context>

<pallas_src>
import functools

import jax
import jax.numpy as jnp
from jax.experimental import pallas as pl
from jax.experimental.pallas import tpu as pltpu


ROWS = 9   # the module hard-codes first.view(9, 5, 1)
C1 = 5     # firstLayer / `conv` channel count
C2 = 3     # post-pool / `conv1` channel count


def _vpu_layer(w_tiles, b_tile, act_row, c_in, *, relu, n_par=2):
    """out = act @ W + b, unrolled as VPU FMAs over lane-batched activations.

    w_tiles[k] : (c_out, NT) tile, row c = W[k, c] replicated along lanes.
    b_tile     : (c_out, NT) tile, row c = b[c]   replicated along lanes.
    act_row(k) : (1, NT) activation row k (sublane-broadcast in the multiply).
    n_par partial accumulators break the serial add chain.
    """
    parts = [None] * n_par
    for k in range(c_in):
        term = w_tiles[k] * act_row(k)
        i = k % n_par
        parts[i] = term if parts[i] is None else parts[i] + term
    acc = parts[0]
    for p in parts[1:]:
        if p is not None:
            acc = acc + p
    acc = acc + b_tile
    return jnp.maximum(acc, 0.0) if relu else acc


def dpcnn_kernel(x_ref, w_ref, o_ref, h_ref, *, inputsize):
    """One lane tile: x_ref (inputsize, NT) -> o_ref (1, NT).

    Lane n of every ref/tile is one (example, row) pair; channels live on
    sublanes.  h_ref is an (8, NT) VMEM scratch reused for every intermediate
    activation so the next layer can cheaply re-read its rows.
    """
    I = inputsize
    # Row offsets inside the packed parameter buffer (see dpcnn_pack_params).
    w1_r = 0
    b1_r = w1_r + I * C1
    wc_r = b1_r + C1
    bc_r = wc_r + C1 * C1
    wc1_r = bc_r + C1
    bc1_r = wc1_r + C2 * C2
    wo_r = bc1_r + C2
    bo_r = wo_r + C2

    def w_tiles(row0, c_in, c_out):
        return [w_ref[row0 + k * c_out: row0 + (k + 1) * c_out, :]
                for k in range(c_in)]

    def b_tile(row0, c_out):
        return w_ref[row0: row0 + c_out, :]

    # ---- firstLayer: Linear(inputsize, 5) + ReLU ----------------------------
    h0 = _vpu_layer(w_tiles(w1_r, I, C1), b_tile(b1_r, C1),
                    lambda k: x_ref[k:k + 1, :], I, relu=True, n_par=4)
    h_ref[0:C1, :] = h0

    # ---- `conv` (Conv1d 5->5, k=1) applied twice with shared weights --------
    wc_t = w_tiles(wc_r, C1, C1)     # hoisted: reused by both applications
    bc_t = b_tile(bc_r, C1)
    h1 = _vpu_layer(wc_t, bc_t, lambda k: h_ref[k:k + 1, :], C1, relu=True)
    h_ref[0:C1, :] = h1
    h2 = _vpu_layer(wc_t, bc_t, lambda k: h_ref[k:k + 1, :], C1, relu=False)
    h_ref[0:C1, :] = h2

    # ---- MaxPool1d(k=3, stride=1) over the channel axis, then ReLU ----------
    p = jnp.maximum(jnp.maximum(h_ref[0:3, :], h_ref[1:4, :]), h_ref[2:5, :])
    h_ref[0:C2, :] = jnp.maximum(p, 0.0)

    # ---- `conv1` (Conv1d 3->3, k=1) + ReLU ----------------------------------
    q = _vpu_layer(w_tiles(wc1_r, C2, C2), b_tile(bc1_r, C2),
                   lambda k: h_ref[k:k + 1, :], C2, relu=True)
    h_ref[0:C2, :] = q

    # ---- second `conv1` folded with `out` Linear(3,1) at pack time:
    #      (q @ wc1 + bc1) @ wo + bo == q @ (wc1 @ wo) + (bc1 @ wo + bo) ------
    o_ref[...] = _vpu_layer(w_tiles(wo_r, C2, 1), b_tile(bo_r, 1),
                            lambda k: h_ref[k:k + 1, :], C2, relu=False)


def dpcnn_pack_params(params, lane_tile=384):
    """Pack all parameters into one lane-replicated f32 buffer (single DMA).

    Call ONCE and reuse; this is deliberately outside the per-call hot path.
    Row layout (each row replicated across `lane_tile` lanes):
      w1 rows [k*5+c], b1 rows [c], wc rows [k*5+c], bc rows [c],
      wc1 rows [k*3+c], bc1 rows [c], (wc1@wo) rows [k], (bc1@wo+bo) row.
    The second `conv1` application and the output Linear are folded here
    (no nonlinearity separates them), removing a layer from the kernel.
    `lane_tile` must be a multiple of 128 and sets the kernel lane-tile width.
    """
    assert lane_tile % 128 == 0
    w1, b1, wc, bc, wc1, bc1, wo, bo = params
    wo_eff = wc1 @ wo                      # (3, 1)
    bo_eff = bc1 @ wo + bo                 # (1, 1)
    col = jnp.concatenate([
        w1.reshape(-1), b1.reshape(-1),
        wc.reshape(-1), bc.reshape(-1),
        wc1.reshape(-1), bc1.reshape(-1),
        wo_eff.reshape(-1), bo_eff.reshape(-1),
    ]).astype(jnp.float32)
    rows = col.shape[0]
    rows_pad = -(-rows // 8) * 8           # pad sublanes to a multiple of 8
    col = jnp.pad(col, (0, rows_pad - rows))
    return jnp.broadcast_to(col[:, None], (rows_pad, lane_tile))


def dpcnn_forward(xb, packed):
    """Batched forward: xb (B, 9, inputsize) -> (B, 9, 1).

    The (example, row) pairs are laid on the lane axis; `packed` (from
    dpcnn_pack_params) fixes the lane-tile width NT.
    """
    B, R, I = xb.shape
    assert R == ROWS, "the module hard-codes 9 rows (first.view(9,5,1))"
    wrows, NT = packed.shape
    N = B * R
    # (B,9,I) -> (I, 9*B): channels on sublanes, (example,row) pairs on lanes.
    x_t = jnp.transpose(xb, (2, 0, 1)).reshape(I, N).astype(jnp.float32)
    n_tiles = -(-N // NT)
    n_pad = n_tiles * NT
    if n_pad != N:
        x_t = jnp.pad(x_t, ((0, 0), (0, n_pad - N)))

    out = pl.pallas_call(
        functools.partial(dpcnn_kernel, inputsize=I),
        out_shape=jax.ShapeDtypeStruct((1, n_pad), jnp.float32),
        grid=(n_tiles,),
        in_specs=[
            pl.BlockSpec((I, NT), lambda i: (0, i)),        # x lane tile
            pl.BlockSpec((wrows, NT), lambda i: (0, 0)),    # params (resident)
        ],
        out_specs=pl.BlockSpec((1, NT), lambda i: (0, i)),  # lane-dense output
        scratch_shapes=[pltpu.VMEM((8, NT), jnp.float32)],
        compiler_params=pltpu.CompilerParams(
            dimension_semantics=("parallel",)),             # v7x: 2 TCs split it
    )(x_t, packed)
    return out[0, :N].reshape(B, ROWS, 1)


def dpcnn_forward_single(x, packed):
    """Exact nn.Module signature: x (9, inputsize) -> (9, 1)."""
    return dpcnn_forward(x[None], packed)[0]


def make_params(key, inputsize):
    """Deterministic synthetic params, PyTorch-style uniform init.

    Weights are stored as (c_in, c_out) == transpose of the PyTorch
    Linear/Conv1d(k=1) weight; biases as (1, c_out).
    """
    ks = jax.random.split(key, 8)

    def unif(k, shape, fan_in):
        bound = 1.0 / jnp.sqrt(jnp.asarray(fan_in, jnp.float32))
        return jax.random.uniform(k, shape, jnp.float32, -bound, bound)

    w1 = unif(ks[0], (inputsize, 5), inputsize)   # firstLayer
    b1 = unif(ks[1], (1, 5), inputsize)
    wc = unif(ks[2], (5, 5), 5)                   # conv (5->5, k=1)
    bc = unif(ks[3], (1, 5), 5)
    wc1 = unif(ks[4], (3, 3), 3)                  # conv1 (3->3, k=1)
    bc1 = unif(ks[5], (1, 3), 3)
    wo = unif(ks[6], (3, 1), 3)                   # out Linear(3,1)
    bo = unif(ks[7], (1, 1), 3)
    return (w1, b1, wc, bc, wc1, bc1, wo, bo)


def dpcnn_reference(x, params):
    """Pure-JAX UNFUSED forward for one (9, inputsize) example."""
    w1, b1, wc, bc, wc1, bc1, wo, bo = params
    h = jnp.maximum(x @ w1 + b1, 0.0)
    h = jnp.maximum(h @ wc + bc, 0.0) @ wc + bc
    p = jnp.maximum(jnp.maximum(h[:, 0:3], h[:, 1:4]), h[:, 2:5])
    p = jnp.maximum(p, 0.0)
    p = jnp.maximum(p @ wc1 + bc1, 0.0) @ wc1 + bc1
    return p @ wo + bo


if __name__ == "__main__":
    inputsize = 16
    batch = 128                       # 9*128 = 1152 lanes = 3 tiles of 384
    key = jax.random.PRNGKey(0)
    kx, kp = jax.random.split(key)
    xb = jax.random.normal(kx, (batch, ROWS, inputsize), jnp.float32)
    params = make_params(kp, inputsize)

    # Pack (and fold) the parameters ONCE, outside the per-call hot path.
    packed = dpcnn_pack_params(params, lane_tile=384)
    fwd = jax.jit(dpcnn_forward)

    out = jax.block_until_ready(fwd(xb, packed))
    assert out.shape == (batch, ROWS, 1)

    ref = jax.vmap(lambda xi: dpcnn_reference(xi, params))(xb)
    assert jnp.allclose(out, ref, atol=1e-5, rtol=1e-5)

    # Single-example path (matches the PyTorch module call exactly).
    out1 = jax.block_until_ready(dpcnn_forward_single(xb[0], packed))
    assert out1.shape == (ROWS, 1)
    assert jnp.allclose(out1, ref[0], atol=1e-5, rtol=1e-5)

    print("KERNEL_OK")
</pallas_src>

<mosaic_0001>
module attributes {stable_mosaic.version = 11 : i64} {
  func.func @dpcnn_kernel(%arg0: i32, %arg1: memref<16x384xf32, #tpu.memory_space<vmem>>, %arg2: memref<136x384xf32, #tpu.memory_space<vmem>>, %arg3: memref<1x384xf32, #tpu.memory_space<vmem>>, %arg4: memref<8x384xf32, #tpu.memory_space<vmem>>) attributes {dimension_semantics = [#tpu.dimension_semantics<parallel>], iteration_bounds = array<i64: 3>, scalar_prefetch = 0 : i64, scratch_operands = 1 : i64, tpu.core_type = #tpu.core_type<tc>, window_params = [{transform_indices = @transform_0, window_bounds = array<i64: 16, 384>}, {pipeline_mode = #tpu.pipeline_mode<synchronous>, transform_indices = @transform_1, window_bounds = array<i64: 136, 384>}, {transform_indices = @transform_2, window_bounds = array<i64: 1, 384>}]} {
    %c0 = arith.constant 0 : index
    %c0_0 = arith.constant 0 : index
    %0 = vector.load %arg2[%c0, %c0_0] : memref<136x384xf32, #tpu.memory_space<vmem>>, vector<5x384xf32>
    %c5 = arith.constant 5 : index
    %c0_1 = arith.constant 0 : index
    %1 = vector.load %arg2[%c5, %c0_1] : memref<136x384xf32, #tpu.memory_space<vmem>>, vector<5x384xf32>
    %c10 = arith.constant 10 : index
    %c0_2 = arith.constant 0 : index
    %2 = vector.load %arg2[%c10, %c0_2] : memref<136x384xf32, #tpu.memory_space<vmem>>, vector<5x384xf32>
    %c15 = arith.constant 15 : index
    %c0_3 = arith.constant 0 : index
    %3 = vector.load %arg2[%c15, %c0_3] : memref<136x384xf32, #tpu.memory_space<vmem>>, vector<5x384xf32>
    %c20 = arith.constant 20 : index
    %c0_4 = arith.constant 0 : index
    %4 = vector.load %arg2[%c20, %c0_4] : memref<136x384xf32, #tpu.memory_space<vmem>>, vector<5x384xf32>
    %c25 = arith.constant 25 : index
    %c0_5 = arith.constant 0 : index
    %5 = vector.load %arg2[%c25, %c0_5] : memref<136x384xf32, #tpu.memory_space<vmem>>, vector<5x384xf32>
    %c30 = arith.constant 30 : index
    %c0_6 = arith.constant 0 : index
    %6 = vector.load %arg2[%c30, %c0_6] : memref<136x384xf32, #tpu.memory_space<vmem>>, vector<5x384xf32>
    %c35 = arith.constant 35 : index
    %c0_7 = arith.constant 0 : index
    %7 = vector.load %arg2[%c35, %c0_7] : memref<136x384xf32, #tpu.memory_space<vmem>>, vector<5x384xf32>
    %c40 = arith.constant 40 : index
    %c0_8 = arith.constant 0 : index
    %8 = vector.load %arg2[%c40, %c0_8] : memref<136x384xf32, #tpu.memory_space<vmem>>, vector<5x384xf32>
    %c45 = arith.constant 45 : index
    %c0_9 = arith.constant 0 : index
    %9 = vector.load %arg2[%c45, %c0_9] : memref<136x384xf32, #tpu.memory_space<vmem>>, vector<5x384xf32>
    %c50 = arith.constant 50 : index
    %c0_10 = arith.constant 0 : index
    %10 = vector.load %arg2[%c50, %c0_10] : memref<136x384xf32, #tpu.memory_space<vmem>>, vector<5x384xf32>
    %c55 = arith.constant 55 : index
    %c0_11 = arith.constant 0 : index
    %11 = vector.load %arg2[%c55, %c0_11] : memref<136x384xf32, #tpu.memory_space<vmem>>, vector<5x384xf32>
    %c60 = arith.constant 60 : index
    %c0_12 = arith.constant 0 : index
    %12 = vector.load %arg2[%c60, %c0_12] : memref<136x384xf32, #tpu.memory_space<vmem>>, vector<5x384xf32>
    %c65 = arith.constant 65 : index
    %c0_13 = arith.constant 0 : index
    %13 = vector.load %arg2[%c65, %c0_13] : memref<136x384xf32, #tpu.memory_space<vmem>>, vector<5x384xf32>
    %c70 = arith.constant 70 : index
    %c0_14 = arith.constant 0 : index
    %14 = vector.load %arg2[%c70, %c0_14] : memref<136x384xf32, #tpu.memory_space<vmem>>, vector<5x384xf32>
    %c75 = arith.constant 75 : index
    %c0_15 = arith.constant 0 : index
    %15 = vector.load %arg2[%c75, %c0_15] : memref<136x384xf32, #tpu.memory_space<vmem>>, vector<5x384xf32>
    %c80 = arith.constant 80 : index
    %c0_16 = arith.constant 0 : index
    %16 = vector.load %arg2[%c80, %c0_16] : memref<136x384xf32, #tpu.memory_space<vmem>>, vector<5x384xf32>
    %c0_17 = arith.constant 0 : index
    %c0_18 = arith.constant 0 : index
    %17 = vector.load %arg1[%c0_17, %c0_18] : memref<16x384xf32, #tpu.memory_space<vmem>>, vector<1x384xf32>
    %18 = vector.broadcast %17 : vector<1x384xf32> to vector<5x384xf32>
    %19 = arith.mulf %0, %18 : vector<5x384xf32>
    %c1 = arith.constant 1 : index
    %c0_19 = arith.constant 0 : index
    %20 = vector.load %arg1[%c1, %c0_19] : memref<16x384xf32, #tpu.memory_space<vmem>>, vector<1x384xf32>
    %21 = vector.broadcast %20 : vector<1x384xf32> to vector<5x384xf32>
    %22 = arith.mulf %1, %21 : vector<5x384xf32>
    %c2 = arith.constant 2 : index
    %c0_20 = arith.constant 0 : index
    %23 = vector.load %arg1[%c2, %c0_20] : memref<16x384xf32, #tpu.memory_space<vmem>>, vector<1x384xf32>
    %24 = vector.broadcast %23 : vector<1x384xf32> to vector<5x384xf32>
    %25 = arith.mulf %2, %24 : vector<5x384xf32>
    %c3 = arith.constant 3 : index
    %c0_21 = arith.constant 0 : index
    %26 = vector.load %arg1[%c3, %c0_21] : memref<16x384xf32, #tpu.memory_space<vmem>>, vector<1x384xf32>
    %27 = vector.broadcast %26 : vector<1x384xf32> to vector<5x384xf32>
    %28 = arith.mulf %3, %27 : vector<5x384xf32>
    %c4 = arith.constant 4 : index
    %c0_22 = arith.constant 0 : index
    %29 = vector.load %arg1[%c4, %c0_22] : memref<16x384xf32, #tpu.memory_space<vmem>>, vector<1x384xf32>
    %30 = vector.broadcast %29 : vector<1x384xf32> to vector<5x384xf32>
    %31 = arith.mulf %4, %30 : vector<5x384xf32>
    %32 = arith.addf %19, %31 : vector<5x384xf32>
    %c5_23 = arith.constant 5 : index
    %c0_24 = arith.constant 0 : index
    %33 = vector.load %arg1[%c5_23, %c0_24] : memref<16x384xf32, #tpu.memory_space<vmem>>, vector<1x384xf32>
    %34 = vector.broadcast %33 : vector<1x384xf32> to vector<5x384xf32>
    %35 = arith.mulf %5, %34 : vector<5x384xf32>
    %36 = arith.addf %22, %35 : vector<5x384xf32>
    %c6 = arith.constant 6 : index
    %c0_25 = arith.constant 0 : index
    %37 = vector.load %arg1[%c6, %c0_25] : memref<16x384xf32, #tpu.memory_space<vmem>>, vector<1x384xf32>
    %38 = vector.broadcast %37 : vector<1x384xf32> to vector<5x384xf32>
    %39 = arith.mulf %6, %38 : vector<5x384xf32>
    %40 = arith.addf %25, %39 : vector<5x384xf32>
    %c7 = arith.constant 7 : index
    %c0_26 = arith.constant 0 : index
    %41 = vector.load %arg1[%c7, %c0_26] : memref<16x384xf32, #tpu.memory_space<vmem>>, vector<1x384xf32>
    %42 = vector.broadcast %41 : vector<1x384xf32> to vector<5x384xf32>
    %43 = arith.mulf %7, %42 : vector<5x384xf32>
    %44 = arith.addf %28, %43 : vector<5x384xf32>
    %c8 = arith.constant 8 : index
    %c0_27 = arith.constant 0 : index
    %45 = vector.load %arg1[%c8, %c0_27] : memref<16x384xf32, #tpu.memory_space<vmem>>, vector<1x384xf32>
    %46 = vector.broadcast %45 : vector<1x384xf32> to vector<5x384xf32>
    %47 = arith.mulf %8, %46 : vector<5x384xf32>
    %48 = arith.addf %32, %47 : vector<5x384xf32>
    %c9 = arith.constant 9 : index
    %c0_28 = arith.constant 0 : index
    %49 = vector.load %arg1[%c9, %c0_28] : memref<16x384xf32, #tpu.memory_space<vmem>>, vector<1x384xf32>
    %50 = vector.broadcast %49 : vector<1x384xf32> to vector<5x384xf32>
    %51 = arith.mulf %9, %50 : vector<5x384xf32>
    %52 = arith.addf %36, %51 : vector<5x384xf32>
    %c10_29 = arith.constant 10 : index
    %c0_30 = arith.constant 0 : index
    %53 = vector.load %arg1[%c10_29, %c0_30] : memref<16x384xf32, #tpu.memory_space<vmem>>, vector<1x384xf32>
    %54 = vector.broadcast %53 : vector<1x384xf32> to vector<5x384xf32>
    %55 = arith.mulf %10, %54 : vector<5x384xf32>
    %56 = arith.addf %40, %55 : vector<5x384xf32>
    %c11 = arith.constant 11 : index
    %c0_31 = arith.constant 0 : index
    %57 = vector.load %arg1[%c11, %c0_31] : memref<16x384xf32, #tpu.memory_space<vmem>>, vector<1x384xf32>
    %58 = vector.broadcast %57 : vector<1x384xf32> to vector<5x384xf32>
    %59 = arith.mulf %11, %58 : vector<5x384xf32>
    %60 = arith.addf %44, %59 : vector<5x384xf32>
    %c12 = arith.constant 12 : index
    %c0_32 = arith.constant 0 : index
    %61 = vector.load %arg1[%c12, %c0_32] : memref<16x384xf32, #tpu.memory_space<vmem>>, vector<1x384xf32>
    %62 = vector.broadcast %61 : vector<1x384xf32> to vector<5x384xf32>
    %63 = arith.mulf %12, %62 : vector<5x384xf32>
    %64 = arith.addf %48, %63 : vector<5x384xf32>
    %c13 = arith.constant 13 : index
    %c0_33 = arith.constant 0 : index
    %65 = vector.load %arg1[%c13, %c0_33] : memref<16x384xf32, #tpu.memory_space<vmem>>, vector<1x384xf32>
    %66 = vector.broadcast %65 : vector<1x384xf32> to vector<5x384xf32>
    %67 = arith.mulf %13, %66 : vector<5x384xf32>
    %68 = arith.addf %52, %67 : vector<5x384xf32>
    %c14 = arith.constant 14 : index
    %c0_34 = arith.constant 0 : index
    %69 = vector.load %arg1[%c14, %c0_34] : memref<16x384xf32, #tpu.memory_space<vmem>>, vector<1x384xf32>
    %70 = vector.broadcast %69 : vector<1x384xf32> to vector<5x384xf32>
    %71 = arith.mulf %14, %70 : vector<5x384xf32>
    %72 = arith.addf %56, %71 : vector<5x384xf32>
    %c15_35 = arith.constant 15 : index
    %c0_36 = arith.constant 0 : index
    %73 = vector.load %arg1[%c15_35, %c0_36] : memref<16x384xf32, #tpu.memory_space<vmem>>, vector<1x384xf32>
    %74 = vector.broadcast %73 : vector<1x384xf32> to vector<5x384xf32>
    %75 = arith.mulf %15, %74 : vector<5x384xf32>
    %76 = arith.addf %60, %75 : vector<5x384xf32>
    %77 = arith.addf %64, %68 : vector<5x384xf32>
    %78 = arith.addf %77, %72 : vector<5x384xf32>
    %79 = arith.addf %78, %76 : vector<5x384xf32>
    %80 = arith.addf %79, %16 : vector<5x384xf32>
    %cst = arith.constant 0.000000e+00 : f32
    %81 = vector.broadcast %cst : f32 to vector<5x384xf32>
    %82 = arith.maximumf %80, %81 : vector<5x384xf32>
    %c0_37 = arith.constant 0 : index
    %c0_38 = arith.constant 0 : index
    %83 = vector.load %arg4[%c0_37, %c0_38] : memref<8x384xf32, #tpu.memory_space<vmem>>, vector<5x384xf32>
    tpu.vector_store %arg4[%c0_37, %c0_38], %82 {strides = array<i32>} : memref<8x384xf32, #tpu.memory_space<vmem>>, vector<5x384xf32>,
    %c85 = arith.constant 85 : index
    %c0_39 = arith.constant 0 : index
    %84 = vector.load %arg2[%c85, %c0_39] : memref<136x384xf32, #tpu.memory_space<vmem>>, vector<5x384xf32>
    %c90 = arith.constant 90 : index
    %c0_40 = arith.constant 0 : index
    %85 = vector.load %arg2[%c90, %c0_40] : memref<136x384xf32, #tpu.memory_space<vmem>>, vector<5x384xf32>
    %c95 = arith.constant 95 : index
    %c0_41 = arith.constant 0 : index
    %86 = vector.load %arg2[%c95, %c0_41] : memref<136x384xf32, #tpu.memory_space<vmem>>, vector<5x384xf32>
    %c100 = arith.constant 100 : index
    %c0_42 = arith.constant 0 : index
    %87 = vector.load %arg2[%c100, %c0_42] : memref<136x384xf32, #tpu.memory_space<vmem>>, vector<5x384xf32>
    %c105 = arith.constant 105 : index
    %c0_43 = arith.constant 0 : index
    %88 = vector.load %arg2[%c105, %c0_43] : memref<136x384xf32, #tpu.memory_space<vmem>>, vector<5x384xf32>
    %c110 = arith.constant 110 : index
    %c0_44 = arith.constant 0 : index
    %89 = vector.load %arg2[%c110, %c0_44] : memref<136x384xf32, #tpu.memory_space<vmem>>, vector<5x384xf32>
    %c0_45 = arith.constant 0 : index
    %c0_46 = arith.constant 0 : index
    %90 = vector.load %arg4[%c0_45, %c0_46] : memref<8x384xf32, #tpu.memory_space<vmem>>, vector<1x384xf32>
    %91 = vector.broadcast %90 : vector<1x384xf32> to vector<5x384xf32>
    %92 = arith.mulf %84, %91 : vector<5x384xf32>
    %c1_47 = arith.constant 1 : index
    %c0_48 = arith.constant 0 : index
    %93 = vector.load %arg4[%c1_47, %c0_48] : memref<8x384xf32, #tpu.memory_space<vmem>>, vector<1x384xf32>
    %94 = vector.broadcast %93 : vector<1x384xf32> to vector<5x384xf32>
    %95 = arith.mulf %85, %94 : vector<5x384xf32>
    %c2_49 = arith.constant 2 : index
    %c0_50 = arith.constant 0 : index
    %96 = vector.load %arg4[%c2_49, %c0_50] : memref<8x384xf32, #tpu.memory_space<vmem>>, vector<1x384xf32>
    %97 = vector.broadcast %96 : vector<1x384xf32> to vector<5x384xf32>
    %98 = arith.mulf %86, %97 : vector<5x384xf32>
    %99 = arith.addf %92, %98 : vector<5x384xf32>
    %c3_51 = arith.constant 3 : index
    %c0_52 = arith.constant 0 : index
    %100 = vector.load %arg4[%c3_51, %c0_52] : memref<8x384xf32, #tpu.memory_space<vmem>>, vector<1x384xf32>
    %101 = vector.broadcast %100 : vector<1x384xf32> to vector<5x384xf32>
    %102 = arith.mulf %87, %101 : vector<5x384xf32>
    %103 = arith.addf %95, %102 : vector<5x384xf32>
    %c4_53 = arith.constant 4 : index
    %c0_54 = arith.constant 0 : index
    %104 = vector.load %arg4[%c4_53, %c0_54] : memref<8x384xf32, #tpu.memory_space<vmem>>, vector<1x384xf32>
    %105 = vector.broadcast %104 : vector<1x384xf32> to vector<5x384xf32>
    %106 = arith.mulf %88, %105 : vector<5x384xf32>
    %107 = arith.addf %99, %106 : vector<5x384xf32>
    %108 = arith.addf %107, %103 : vector<5x384xf32>
    %109 = arith.addf %108, %89 : vector<5x384xf32>
    %cst_55 = arith.constant 0.000000e+00 : f32
    %110 = vector.broadcast %cst_55 : f32 to vector<5x384xf32>
    %111 = arith.maximumf %109, %110 : vector<5x384xf32>
    %c0_56 = arith.constant 0 : index
    %c0_57 = arith.constant 0 : index
    %112 = vector.load %arg4[%c0_56, %c0_57] : memref<8x384xf32, #tpu.memory_space<vmem>>, vector<5x384xf32>
    tpu.vector_store %arg4[%c0_56, %c0_57], %111 {strides = array<i32>} : memref<8x384xf32, #tpu.memory_space<vmem>>, vector<5x384xf32>,
    %c0_58 = arith.constant 0 : index
    %c0_59 = arith.constant 0 : index
    %113 = vector.load %arg4[%c0_58, %c0_59] : memref<8x384xf32, #tpu.memory_space<vmem>>, vector<1x384xf32>
    %114 = vector.broadcast %113 : vector<1x384xf32> to vector<5x384xf32>
    %115 = arith.mulf %84, %114 : vector<5x384xf32>
    %c1_60 = arith.constant 1 : index
    %c0_61 = arith.constant 0 : index
    %116 = vector.load %arg4[%c1_60, %c0_61] : memref<8x384xf32, #tpu.memory_space<vmem>>, vector<1x384xf32>
    %117 = vector.broadcast %116 : vector<1x384xf32> to vector<5x384xf32>
    %118 = arith.mulf %85, %117 : vector<5x384xf32>
    %c2_62 = arith.constant 2 : index
    %c0_63 = arith.constant 0 : index
    %119 = vector.load %arg4[%c2_62, %c0_63] : memref<8x384xf32, #tpu.memory_space<vmem>>, vector<1x384xf32>
    %120 = vector.broadcast %119 : vector<1x384xf32> to vector<5x384xf32>
    %121 = arith.mulf %86, %120 : vector<5x384xf32>
    %122 = arith.addf %115, %121 : vector<5x384xf32>
    %c3_64 = arith.constant 3 : index
    %c0_65 = arith.constant 0 : index
    %123 = vector.load %arg4[%c3_64, %c0_65] : memref<8x384xf32, #tpu.memory_space<vmem>>, vector<1x384xf32>
    %124 = vector.broadcast %123 : vector<1x384xf32> to vector<5x384xf32>
    %125 = arith.mulf %87, %124 : vector<5x384xf32>
    %126 = arith.addf %118, %125 : vector<5x384xf32>
    %c4_66 = arith.constant 4 : index
    %c0_67 = arith.constant 0 : index
    %127 = vector.load %arg4[%c4_66, %c0_67] : memref<8x384xf32, #tpu.memory_space<vmem>>, vector<1x384xf32>
    %128 = vector.broadcast %127 : vector<1x384xf32> to vector<5x384xf32>
    %129 = arith.mulf %88, %128 : vector<5x384xf32>
    %130 = arith.addf %122, %129 : vector<5x384xf32>
    %131 = arith.addf %130, %126 : vector<5x384xf32>
    %132 = arith.addf %131, %89 : vector<5x384xf32>
    %c0_68 = arith.constant 0 : index
    %c0_69 = arith.constant 0 : index
    %133 = vector.load %arg4[%c0_68, %c0_69] : memref<8x384xf32, #tpu.memory_space<vmem>>, vector<5x384xf32>
    tpu.vector_store %arg4[%c0_68, %c0_69], %132 {strides = array<i32>} : memref<8x384xf32, #tpu.memory_space<vmem>>, vector<5x384xf32>,
    %c0_70 = arith.constant 0 : index
    %c0_71 = arith.constant 0 : index
    %134 = vector.load %arg4[%c0_70, %c0_71] : memref<8x384xf32, #tpu.memory_space<vmem>>, vector<3x384xf32>
    %c1_72 = arith.constant 1 : index
    %c0_73 = arith.constant 0 : index
    %135 = vector.load %arg4[%c1_72, %c0_73] : memref<8x384xf32, #tpu.memory_space<vmem>>, vector<3x384xf32>
    %136 = arith.maximumf %134, %135 : vector<3x384xf32>
    %c2_74 = arith.constant 2 : index
    %c0_75 = arith.constant 0 : index
    %137 = vector.load %arg4[%c2_74, %c0_75] : memref<8x384xf32, #tpu.memory_space<vmem>>, vector<3x384xf32>
    %138 = arith.maximumf %136, %137 : vector<3x384xf32>
    %cst_76 = arith.constant 0.000000e+00 : f32
    %139 = vector.broadcast %cst_76 : f32 to vector<3x384xf32>
    %140 = arith.maximumf %138, %139 : vector<3x384xf32>
    %c0_77 = arith.constant 0 : index
    %c0_78 = arith.constant 0 : index
    %141 = vector.load %arg4[%c0_77, %c0_78] : memref<8x384xf32, #tpu.memory_space<vmem>>, vector<3x384xf32>
    tpu.vector_store %arg4[%c0_77, %c0_78], %140 {strides = array<i32>} : memref<8x384xf32, #tpu.memory_space<vmem>>, vector<3x384xf32>,
    %c115 = arith.constant 115 : index
    %c0_79 = arith.constant 0 : index
    %142 = vector.load %arg2[%c115, %c0_79] : memref<136x384xf32, #tpu.memory_space<vmem>>, vector<3x384xf32>
    %c118 = arith.constant 118 : index
    %c0_80 = arith.constant 0 : index
    %143 = vector.load %arg2[%c118, %c0_80] : memref<136x384xf32, #tpu.memory_space<vmem>>, vector<3x384xf32>
    %c121 = arith.constant 121 : index
    %c0_81 = arith.constant 0 : index
    %144 = vector.load %arg2[%c121, %c0_81] : memref<136x384xf32, #tpu.memory_space<vmem>>, vector<3x384xf32>
    %c124 = arith.constant 124 : index
    %c0_82 = arith.constant 0 : index
    %145 = vector.load %arg2[%c124, %c0_82] : memref<136x384xf32, #tpu.memory_space<vmem>>, vector<3x384xf32>
    %c0_83 = arith.constant 0 : index
    %c0_84 = arith.constant 0 : index
    %146 = vector.load %arg4[%c0_83, %c0_84] : memref<8x384xf32, #tpu.memory_space<vmem>>, vector<1x384xf32>
    %147 = vector.broadcast %146 : vector<1x384xf32> to vector<3x384xf32>
    %148 = arith.mulf %142, %147 : vector<3x384xf32>
    %c1_85 = arith.constant 1 : index
    %c0_86 = arith.constant 0 : index
    %149 = vector.load %arg4[%c1_85, %c0_86] : memref<8x384xf32, #tpu.memory_space<vmem>>, vector<1x384xf32>
    %150 = vector.broadcast %149 : vector<1x384xf32> to vector<3x384xf32>
    %151 = arith.mulf %143, %150 : vector<3x384xf32>
    %c2_87 = arith.constant 2 : index
    %c0_88 = arith.constant 0 : index
    %152 = vector.load %arg4[%c2_87, %c0_88] : memref<8x384xf32, #tpu.memory_space<vmem>>, vector<1x384xf32>
    %153 = vector.broadcast %152 : vector<1x384xf32> to vector<3x384xf32>
    %154 = arith.mulf %144, %153 : vector<3x384xf32>
    %155 = arith.addf %148, %154 : vector<3x384xf32>
    %156 = arith.addf %155, %151 : vector<3x384xf32>
    %157 = arith.addf %156, %145 : vector<3x384xf32>
    %cst_89 = arith.constant 0.000000e+00 : f32
    %158 = vector.broadcast %cst_89 : f32 to vector<3x384xf32>
    %159 = arith.maximumf %157, %158 : vector<3x384xf32>
    %c0_90 = arith.constant 0 : index
    %c0_91 = arith.constant 0 : index
    %160 = vector.load %arg4[%c0_90, %c0_91] : memref<8x384xf32, #tpu.memory_space<vmem>>, vector<3x384xf32>
    tpu.vector_store %arg4[%c0_90, %c0_91], %159 {strides = array<i32>} : memref<8x384xf32, #tpu.memory_space<vmem>>, vector<3x384xf32>,
    %c127 = arith.constant 127 : index
    %c0_92 = arith.constant 0 : index
    %161 = vector.load %arg2[%c127, %c0_92] : memref<136x384xf32, #tpu.memory_space<vmem>>, vector<1x384xf32>
    %c128 = arith.constant 128 : index
    %c0_93 = arith.constant 0 : index
    %162 = vector.load %arg2[%c128, %c0_93] : memref<136x384xf32, #tpu.memory_space<vmem>>, vector<1x384xf32>
    %c129 = arith.constant 129 : index
    %c0_94 = arith.constant 0 : index
    %163 = vector.load %arg2[%c129, %c0_94] : memref<136x384xf32, #tpu.memory_space<vmem>>, vector<1x384xf32>
    %c130 = arith.constant 130 : index
    %c0_95 = arith.constant 0 : index
    %164 = vector.load %arg2[%c130, %c0_95] : memref<136x384xf32, #tpu.memory_space<vmem>>, vector<1x384xf32>
    %c0_96 = arith.constant 0 : index
    %c0_97 = arith.constant 0 : index
    %165 = vector.load %arg4[%c0_96, %c0_97] : memref<8x384xf32, #tpu.memory_space<vmem>>, vector<1x384xf32>
    %166 = arith.mulf %161, %165 : vector<1x384xf32>
    %c1_98 = arith.constant 1 : index
    %c0_99 = arith.constant 0 : index
    %167 = vector.load %arg4[%c1_98, %c0_99] : memref<8x384xf32, #tpu.memory_space<vmem>>, vector<1x384xf32>
    %168 = arith.mulf %162, %167 : vector<1x384xf32>
    %c2_100 = arith.constant 2 : index
    %c0_101 = arith.constant 0 : index
    %169 = vector.load %arg4[%c2_100, %c0_101] : memref<8x384xf32, #tpu.memory_space<vmem>>, vector<1x384xf32>
    %170 = arith.mulf %163, %169 : vector<1x384xf32>
    %171 = arith.addf %166, %170 : vector<1x384xf32>
    %172 = arith.addf %171, %168 : vector<1x384xf32>
    %173 = arith.addf %172, %164 : vector<1x384xf32>
    %c0_102 = arith.constant 0 : index
    %c0_103 = arith.constant 0 : index
    %174 = vector.load %arg3[%c0_102, %c0_103] : memref<1x384xf32, #tpu.memory_space<vmem>>, vector<1x384xf32>
    tpu.vector_store %arg3[%c0_102, %c0_103], %173 {strides = array<i32>} : memref<1x384xf32, #tpu.memory_space<vmem>>, vector<1x384xf32>,
    return
  }
  func.func @transform_0(%arg0: i32) -> (i32, i32) {
    %c0_i32 = arith.constant 0 : i32
    %c0_i32_0 = arith.constant 0 : i32
    return %c0_i32, %arg0 : i32, i32
  }
  func.func @transform_1(%arg0: i32) -> (i32, i32) {
    %c0_i32 = arith.constant 0 : i32
    %c0_i32_0 = arith.constant 0 : i32
    %c0_i32_1 = arith.constant 0 : i32
    return %c0_i32, %c0_i32_0 : i32, i32
  }
  func.func @transform_2(%arg0: i32) -> (i32, i32) {
    %c0_i32 = arith.constant 0 : i32
    %c0_i32_0 = arith.constant 0 : i32
    return %c0_i32, %arg0 : i32, i32
  }
}

</mosaic_0001>

<bundles_post_ra>
// kernel: squeeze.1
= control target key start
LH: loop header
LB: loop body
LE: loop exit
PB: predicated region body
PF: predicated region fallthrough
CT: control target
= control target key end

     0   :  { %s1319_s10 = smov 127   ;;  %s1320_s11 = smov 125   ;;  %vm3_vm0 = vcmask 72704   ;;  %vm829_vm1 = vcmask 982016   ;;  %vm843_vm2 = vcmask 990208   ;;  %vm857_vm3 = vcmask 998400   ;;  %s2392_s0 = inlined_call_operand.vmem [shape: f32[1152], index: 0, kind: input, shape index: {}]   ;;  %s2393_s1 = inlined_call_operand.vmem [shape: f32[128,9,1], index: 1, kind: output, shape index: {}]  }
   0x1   :  { %v936_v0 = vld [vmem:[%s2392_s0 + $0x4] sm:$0x1]   ;;  %v940_v1 = vld [vmem:[%s2392_s0 + $0x3] sm:$0x1]   ;;  %v944_v2 = vld [vmem:[%s2392_s0 + $0x2] sm:$0x1]  }
   0x2   :  { %7 = vrot.lane.b32.xlu0 %v936_v0, %s1319_s10  ;;  %21 = vrot.lane.b32.xlu1 %v940_v1, %s1320_s11  ;;  %s1321_s14 = smov 123   ;;  %v938_v3 = vld [vmem:[%s2392_s0 + $0x8] sm:$0x1]   ;;  %v942_v4 = vld [vmem:[%s2392_s0 + $0x7] sm:$0x1]   ;;  %s1322_s19 = smov 126  }
   0x3   :  { %35 = vrot.lane.b32.xlu2 %v944_v2, %s1321_s14  ;;  %s1323_s20 = smov 124   ;;  %v946_v5 = vld [vmem:[%s2392_s0 + $0x6] sm:$0x1]   ;;  %s1324_s23 = smov 122   ;;  %v948_v6 = vld [vmem:[%s2392_s0 + $0x1] sm:$0x1]  }
   0x4   :  { %v950_v7 = vld [vmem:[%s2392_s0 + $0x5] sm:$0x1]   ;;  %s1325_s28 = smov 121   ;;  %s1326_s29 = smov 120   ;;  %v61_v8 = vld [vmem:[%s2392_s0] sm:$0x1]  }
   0x5   :  { %s1327_s3 = smov 119   ;;  %v953_v9 = vld [vmem:[%s2392_s0 + $0x4] sm:$0x1]   ;;  %v955_v10 = vld [vmem:[%s2392_s0 + $0x8] sm:$0x1]   ;;  %s1328_s8 = smov 118  }
   0x6   :  { %s1329_s9 = smov 117   ;;  %v957_v11 = vld [vmem:[%s2392_s0 + $0x3] sm:$0x1]   ;;  %s1330_s12 = smov 116   ;;  %v959_v12 = vld [vmem:[%s2392_s0 + $0x7] sm:$0x1]  }
   0x7   :  { %v961_v13 = vld [vmem:[%s2392_s0 + $0x2] sm:$0x1]   ;;  %s1331_s17 = smov 115   ;;  %s1332_s18 = smov 114   ;;  %v963_v14 = vld [vmem:[%s2392_s0 + $0x6] sm:$0x1]  }
   0x8   :  { %s1333_s21 = smov 113   ;;  %v965_v15 = vld [vmem:[%s2392_s0 + $0x1] sm:$0x1]   ;;  %v967_v16 = vld [vmem:[%s2392_s0 + $0x5] sm:$0x1]   ;;  %s1334_s26 = smov 112  }
   0x9   :  { %s1335_s27 = smov 111   ;;  %v123_v17 = vld [vmem:[%s2392_s0] sm:$0x1]   ;;  %s1336_s30 = smov 110   ;;  %v970_v18 = vld [vmem:[%s2392_s0 + $0x4] sm:$0x1]  }
   0xa   :  { %14 = vrot.lane.b32.xlu0 %v938_v3, %s1322_s19  ;;  %28 = vrot.lane.b32.xlu1 %v942_v4, %s1323_s20  ;;  %v972_v19 = vld [vmem:[%s2392_s0 + $0x8] sm:$0x1]   ;;  %s1337_s6 = smov 109   ;;  %s1338_s7 = smov 108   ;;  %v974_v20 = vld [vmem:[%s2392_s0 + $0x3] sm:$0x1]  }
   0xb   :  { %42 = vrot.lane.b32.xlu2 %v946_v5, %s1324_s23  ;;  %s1339_s10 = smov 107   ;;  %v976_v21 = vld [vmem:[%s2392_s0 + $0x7] sm:$0x1]   ;;  %v978_v22 = vld [vmem:[%s2392_s0 + $0x2] sm:$0x1]   ;;  %s1340_s15 = smov 106  }
   0xc   :  { %s1341_s16 = smov 105   ;;  %v980_v23 = vld [vmem:[%s2392_s0 + $0x6] sm:$0x1]   ;;  %s1342_s19 = smov 104   ;;  %v982_v24 = vld [vmem:[%s2392_s0 + $0x1] sm:$0x1]  }
   0xd   :  { %v984_v25 = vld [vmem:[%s2392_s0 + $0x5] sm:$0x1]   ;;  %s1343_s24 = smov 103   ;;  %s1344_s25 = smov 102   ;;  %v185_v26 = vld [vmem:[%s2392_s0] sm:$0x1]  }
   0xe   :  { %v987_v27 = vld [vmem:[%s2392_s0 + $0x4] sm:$0x1]   ;;  %v989_v28 = vld [vmem:[%s2392_s0 + $0x8] sm:$0x1]   ;;  %s1346_s4 = smov 100   ;;  %s1347_s5 = smov 99  }
   0xf   :  { %v991_v29 = vld [vmem:[%s2392_s0 + $0x3] sm:$0x1]   ;;  %v993_v30 = vld [vmem:[%s2392_s0 + $0x7] sm:$0x1]   ;;  %v995_v31 = vld [vmem:[%s2392_s0 + $0x2] sm:$0x1]  }
  0x10   :  { %s1349_s13 = smov 97   ;;  %s1350_s14 = smov 96   ;;  %v997_v32 = vld [vmem:[%s2392_s0 + $0x6] sm:$0x1]   ;;  %v999_v33 = vld [vmem:[%s2392_s0 + $0x1] sm:$0x1]  }
  0x11   :  { %v1001_v34 = vld [vmem:[%s2392_s0 + $0x5] sm:$0x1]   ;;  %s1352_s22 = smov 94   ;;  %s1353_s23 = smov 93   ;;  %v247_v35 = vld [vmem:[%s2392_s0] sm:$0x1]  }
  0x12   :  { %49 = vrot.lane.b32.xlu0 %v948_v6, %s1325_s28  ;;  %56 = vrot.lane.b32.xlu1 %v950_v7, %s1326_s29  ;;  %s1345_s28 = smov 101   ;;  %v1004_v36 = vld [vmem:[%s2392_s0 + $0x4] sm:$0x1]   ;;  %v1006_v37 = vld [vmem:[%s2392_s0 + $0x8] sm:$0x1]   ;;  %s1374_s29 = smov 72  }
  0x13   :  { %62 = vrot.lane.b32.xlu2 %v61_v8, %s1327_s3  ;;  %v1008_v39 = vld [vmem:[%s2392_s0 + $0x3] sm:$0x1]   ;;  %v1010_v40 = vld [vmem:[%s2392_s0 + $0x7] sm:$0x1]   ;;  %v1012_v41 = vld [vmem:[%s2392_s0 + $0x2] sm:$0x1]  }
  0x14   :  { %v1014_v43 = vld [vmem:[%s2392_s0 + $0x6] sm:$0x1]   ;;  %v1016_v44 = vld [vmem:[%s2392_s0 + $0x1] sm:$0x1]   ;;  %v1018_v45 = vld [vmem:[%s2392_s0 + $0x5] sm:$0x1]  }
  0x15   :  { %v309_v47 = vld [vmem:[%s2392_s0] sm:$0x1]   ;;  %s1363_s3 = smov 83   ;;  %v1021_v50 = vld [vmem:[%s2392_s0 + $0x4] sm:$0x1]   ;;  %s1378_s20 = smov 68  }
  0x16   :  { %v1023_v51 = vld [vmem:[%s2392_s0 + $0x8] sm:$0x1]   ;;  %v1025_v53 = vld [vmem:[%s2392_s0 + $0x3] sm:$0x1]   ;;  %v1027_v56 = vld [vmem:[%s2392_s0 + $0x7] sm:$0x1]  }
  0x17   :  { %v1029_v57 = vld [vmem:[%s2392_s0 + $0x2] sm:$0x1]   ;;  %v1031_v59 = vld [vmem:[%s2392_s0 + $0x6] sm:$0x1]   ;;  %v1033_v62 = vld [vmem:[%s2392_s0 + $0x1] sm:$0x1]  }
  0x18   :  { %v1035_v63 = vld [vmem:[%s2392_s0 + $0x5] sm:$0x1]   ;;  %v371_v1 = vld [vmem:[%s2392_s0] sm:$0x1]   ;;  %v1038_v4 = vld [vmem:[%s2392_s0 + $0x4] sm:$0x1]  }
  0x19   :  { %v1040_v5 = vld [vmem:[%s2392_s0 + $0x8] sm:$0x1]   ;;  %v1042_v7 = vld [vmem:[%s2392_s0 + $0x3] sm:$0x1]   ;;  %s1386_s2 = smov 60   ;;  %s1411_s11 = smov 35  }
  0x1a   :  { %69 = vrot.lane.b32.xlu0 %v953_v9, %s1328_s8  ;;  %76 = vrot.lane.b32.xlu1 %v955_v10, %s1329_s9  ;;  %s1348_s8 = smov 98   ;;  %v1044_v10 = vld [vmem:[%s2392_s0 + $0x7] sm:$0x1]   ;;  %s1399_s9 = smov 47   ;;  %vm871_vm4 = vcmask 1006592   ;;  %vm885_vm5 = vcmask 1014784  }
  0x1b   :  { %83 = vrot.lane.b32.xlu2 %v957_v11, %s1330_s12  ;;  %s1364_s12 = smov 82   ;;  %v1046_v11 = vld [vmem:[%s2392_s0 + $0x2] sm:$0x1]   ;;  %vm899_vm6 = vcmask 1022976   ;;  %vm912_vm7 = vcmask 1031168   ;;  %vm926_vm8 = vcmask 1039360  }
  0x1c   :  { %vm861_vm9 = vcmask 48128   ;;  %vm864_vm10 = vcmask 72752   ;;  %vm903_vm11 = vcmask 23552   ;;  %vm906_vm12 = vcmask 72728  }
  0x1d   :  { %vm833_vm13 = vcmask 64512   ;;  %vm836_vm14 = vcmask 72768   ;;  %vm847_vm15 = vcmask 56320  }
  0x22   :  { %90 = vrot.lane.b32.xlu0 %v959_v12, %s1331_s17  ;;  %97 = vrot.lane.b32.xlu1 %v961_v13, %s1332_s18  ;;  %s1351_s17 = smov 95   ;;  %s1366_s18 = smov 80   ;;  %v1048_v13 = vld [vmem:[%s2392_s0 + $0x6] sm:$0x1]  }
  0x23   :  { %104 = vrot.lane.b32.xlu2 %v963_v14, %s1333_s21  ;;  %s1384_s21 = smov 62  }
  0x2a   :  { %111 = vrot.lane.b32.xlu0 %v965_v15, %s1334_s26  ;;  %118 = vrot.lane.b32.xlu1 %v967_v16, %s1335_s27  ;;  %s1354_s26 = smov 92   ;;  %s1362_s27 = smov 84   ;;  %v1050_v16 = vld [vmem:[%s2392_s0 + $0x1] sm:$0x1]  }
  0x2b   :  { %124 = vrot.lane.b32.xlu2 %v123_v17, %s1336_s30  ;;  %v1052_v17 = vld [vmem:[%s2392_s0 + $0x5] sm:$0x1]   ;;  %s1380_s30 = smov 66  }
  0x32   :  { %131 = vrot.lane.b32.xlu0 %v970_v18, %s1337_s6  ;;  %138 = vrot.lane.b32.xlu1 %v972_v19, %s1338_s7  ;;  %v433_v19 = vld [vmem:[%s2392_s0] sm:$0x1]   ;;  %s1381_s6 = smov 65   ;;  %s1387_s7 = smov 59  }
  0x33   :  { %145 = vrot.lane.b32.xlu2 %v974_v20, %s1339_s10  ;;  %s1405_s10 = smov 41  }
  0x3a   :  { %152 = vrot.lane.b32.xlu0 %v976_v21, %s1340_s15  ;;  %159 = vrot.lane.b32.xlu1 %v978_v22, %s1341_s16  ;;  %s1358_s15 = smov 88   ;;  %s1359_s16 = smov 87   ;;  %v1055_v22 = vld [vmem:[%s2392_s0 + $0x4] sm:$0x1]  }
  0x3b   :  { %166 = vrot.lane.b32.xlu2 %v980_v23, %s1342_s19  ;;  %s1360_s19 = smov 86   ;;  %v1057_v23 = vld [vmem:[%s2392_s0 + $0x8] sm:$0x1]  }
  0x42   :  { %173 = vrot.lane.b32.xlu0 %v982_v24, %s1343_s24  ;;  %180 = vrot.lane.b32.xlu1 %v984_v25, %s1344_s25  ;;  %v1059_v25 = vld [vmem:[%s2392_s0 + $0x3] sm:$0x1]   ;;  %s1402_s24 = smov 44   ;;  %s1408_s25 = smov 38  }
  0x43   :  { %186 = vrot.lane.b32.xlu2 %v185_v26, %s1345_s28  ;;  %s1368_s28 = smov 78  }
  0x4a   :  { %193 = vrot.lane.b32.xlu0 %v987_v27, %s1346_s4  ;;  %200 = vrot.lane.b32.xlu1 %v989_v28, %s1347_s5  ;;  %s1355_s4 = smov 91   ;;  %s1356_s5 = smov 90   ;;  %v1061_v28 = vld [vmem:[%s2392_s0 + $0x7] sm:$0x1]  }
  0x4b   :  { %207 = vrot.lane.b32.xlu2 %v991_v29, %s1348_s8  ;;  %s1357_s8 = smov 89   ;;  %v1063_v29 = vld [vmem:[%s2392_s0 + $0x2] sm:$0x1]  }
  0x52   :  { %214 = vrot.lane.b32.xlu0 %v993_v30, %s1349_s13  ;;  %221 = vrot.lane.b32.xlu1 %v995_v31, %s1350_s14  ;;  %s1365_s13 = smov 81   ;;  %s1371_s14 = smov 75   ;;  %v1065_v31 = vld [vmem:[%s2392_s0 + $0x6] sm:$0x1]  }
  0x53   :  { %228 = vrot.lane.b32.xlu2 %v997_v32, %s1351_s17  ;;  %s1389_s17 = smov 57  }
  0x5a   :  { %235 = vrot.lane.b32.xlu0 %v999_v33, %s1352_s22  ;;  %242 = vrot.lane.b32.xlu1 %v1001_v34, %s1353_s23  ;;  %v1067_v34 = vld [vmem:[%s2392_s0 + $0x1] sm:$0x1]   ;;  %s1390_s22 = smov 56   ;;  %s1396_s23 = smov 50  }
  0x5b   :  { %248 = vrot.lane.b32.xlu2 %v247_v35, %s1354_s26  ;;  %s1361_s26 = smov 85   ;;  %v1069_v35 = vld [vmem:[%s2392_s0 + $0x5] sm:$0x1]  }
  0x5d   :  { %v36_v38 = vpop.permute.xlu2 %35  }
  0x5e   :  { %945 = vst.msk [vmem:[%s2393_s1 + $0x1d] sm:$0x1] %vm3_vm0, %v36_v38  }
  0x62   :  { %255 = vrot.lane.b32.xlu0 %v1004_v36, %s1355_s4  ;;  %262 = vrot.lane.b32.xlu1 %v1006_v37, %s1356_s5  ;;  %s1369_s4 = smov 77   ;;  %s1375_s5 = smov 71   ;;  %v495_v37 = vld [vmem:[%s2392_s0] sm:$0x1]  }
  0x63   :  { %269 = vrot.lane.b32.xlu2 %v1008_v39, %s1357_s8  ;;  %s1393_s8 = smov 53  }
  0x65   :  { %v43_v42 = vpop.permute.xlu2 %42  }
  0x66   :  { %947 = vst.msk [vmem:[%s2393_s1 + $0x56] sm:$0x1] %vm3_vm0, %v43_v42  }
  0x6a   :  { %276 = vrot.lane.b32.xlu0 %v1010_v40, %s1358_s15  ;;  %283 = vrot.lane.b32.xlu1 %v1012_v41, %s1359_s16  ;;  %s1377_s15 = smov 69   ;;  %s1383_s16 = smov 63   ;;  %v1072_v40 = vld [vmem:[%s2392_s0 + $0x4] sm:$0x1]   ;;  %v1074_v41 = vld [vmem:[%s2392_s0 + $0x8] sm:$0x1]  }
  0x6b   :  { %290 = vrot.lane.b32.xlu2 %v1014_v43, %s1360_s19  ;;  %s1372_s19 = smov 74   ;;  %v1076_v43 = vld [vmem:[%s2392_s0 + $0x3] sm:$0x1]  }
  0x6d   :  { %v63_v46 = vpop.permute.xlu2 %62  }
  0x6e   :  { %952 = vst.msk [vmem:[%s2393_s1 + $0x1] sm:$0x1] %vm3_vm0, %v63_v46   ;;  %v1078_v46 = vld [vmem:[%s2392_s0 + $0x7] sm:$0x1]  }
  0x72   :  { %297 = vrot.lane.b32.xlu0 %v1016_v44, %s1361_s26  ;;  %304 = vrot.lane.b32.xlu1 %v1018_v45, %s1362_s27  ;;  %s1367_s27 = smov 79   ;;  %s1414_s26 = smov 32  }
  0x73   :  { %310 = vrot.lane.b32.xlu2 %v309_v47, %s1363_s3  ;;  %s1392_s3 = smov 54   ;;  %v1080_v47 = vld [vmem:[%s2392_s0 + $0x2] sm:$0x1]  }
  0x74   :  { %v8_v48 = vpop.permute.xlu0 %7   ;;  %v22_v49 = vpop.permute.xlu1 %21  }
  0x75   :  { %937 = vst.msk [vmem:[%s2393_s1 + $0x39] sm:$0x1] %vm3_vm0, %v8_v48   ;;  %v84_v52 = vpop.permute.xlu2 %83  }
  0x76   :  { %941 = vst.msk [vmem:[%s2393_s1 + $0x2b] sm:$0x1] %vm3_vm0, %v22_v49   ;;  %v1082_v49 = vld [vmem:[%s2392_s0 + $0x6] sm:$0x1]  }
  0x77   :  { %958 = vst.msk [vmem:[%s2393_s1 + $0x2c] sm:$0x1] %vm3_vm0, %v84_v52   ;;  %v1084_v52 = vld [vmem:[%s2392_s0 + $0x1] sm:$0x1]  }
  0x7a   :  { %317 = vrot.lane.b32.xlu0 %v1021_v50, %s1364_s12  ;;  %324 = vrot.lane.b32.xlu1 %v1023_v51, %s1365_s13  ;;  %s1370_s13 = smov 76   ;;  %s1417_s12 = smov 29  }
  0x7b   :  { %331 = vrot.lane.b32.xlu2 %v1025_v53, %s1366_s18  ;;  %s1395_s18 = smov 51   ;;  %v1086_v53 = vld [vmem:[%s2392_s0 + $0x5] sm:$0x1]  }
  0x7c   :  { %v15_v54 = vpop.permute.xlu0 %14   ;;  %v29_v55 = vpop.permute.xlu1 %28  }
  0x7d   :  { %939 = vst.msk [vmem:[%s2393_s1 + $0x72] sm:$0x1] %vm3_vm0, %v15_v54   ;;  %v105_v58 = vpop.permute.xlu2 %104  }
  0x7e   :  { %943 = vst.msk [vmem:[%s2393_s1 + $0x64] sm:$0x1] %vm3_vm0, %v29_v55   ;;  %v557_v55 = vld [vmem:[%s2392_s0] sm:$0x1]  }
  0x7f   :  { %964 = vst.msk [vmem:[%s2393_s1 + $0x57] sm:$0x1] %vm3_vm0, %v105_v58   ;;  %v1089_v58 = vld [vmem:[%s2392_s0 + $0x4] sm:$0x1]  }
  0x82   :  { %338 = vrot.lane.b32.xlu0 %v1027_v56, %s1367_s27  ;;  %345 = vrot.lane.b32.xlu1 %v1029_v57, %s1368_s28  ;;  %s1373_s28 = smov 73   ;;  %s1420_s27 = smov 26  }
  0x83   :  { %352 = vrot.lane.b32.xlu2 %v1031_v59, %s1369_s4  ;;  %s1398_s4 = smov 48   ;;  %v1091_v59 = vld [vmem:[%s2392_s0 + $0x8] sm:$0x1]  }
  0x84   :  { %v50_v60 = vpop.permute.xlu0 %49   ;;  %v57_v61 = vpop.permute.xlu1 %56  }
  0x85   :  { %949 = vst.msk [vmem:[%s2393_s1 + $0xf] sm:$0x1] %vm3_vm0, %v50_v60   ;;  %v125_v0 = vpop.permute.xlu2 %124  }
  0x86   :  { %951 = vst.msk [vmem:[%s2393_s1 + $0x48] sm:$0x1] %vm3_vm0, %v57_v61   ;;  %v1093_v61 = vld [vmem:[%s2392_s0 + $0x3] sm:$0x1]  }
  0x87   :  { %969 = vst.msk [vmem:[%s2393_s1 + $0x2] sm:$0x1] %vm3_vm0, %v125_v0   ;;  %v1095_v0 = vld [vmem:[%s2392_s0 + $0x7] sm:$0x1]  }
  0x8a   :  { %359 = vrot.lane.b32.xlu0 %v1033_v62, %s1370_s13  ;;  %366 = vrot.lane.b32.xlu1 %v1035_v63, %s1371_s14  ;;  %s1376_s14 = smov 70   ;;  %s1423_s13 = smov 23  }
  0x8b   :  { %372 = vrot.lane.b32.xlu2 %v371_v1, %s1372_s19  ;;  %s1401_s19 = smov 45   ;;  %v1097_v1 = vld [vmem:[%s2392_s0 + $0x2] sm:$0x1]  }
  0x8c   :  { %v70_v2 = vpop.permute.xlu0 %69   ;;  %v77_v3 = vpop.permute.xlu1 %76  }
  0x8d   :  { %954 = vst.msk [vmem:[%s2393_s1 + $0x3a] sm:$0x1] %vm3_vm0, %v70_v2   ;;  %v146_v6 = vpop.permute.xlu2 %145  }
  0x8e   :  { %956 = vst.msk [vmem:[%s2393_s1 + $0x73] sm:$0x1] %vm3_vm0, %v77_v3   ;;  %v1099_v3 = vld [vmem:[%s2392_s0 + $0x6] sm:$0x1]  }
  0x8f   :  { %975 = vst.msk [vmem:[%s2393_s1 + $0x2d] sm:$0x1] %vm3_vm0, %v146_v6   ;;  %v1101_v6 = vld [vmem:[%s2392_s0 + $0x1] sm:$0x1]  }
  0x92   :  { %379 = vrot.lane.b32.xlu0 %v1038_v4, %s1373_s28  ;;  %386 = vrot.lane.b32.xlu1 %v1040_v5, %s1374_s29  ;;  %s1379_s29 = smov 67   ;;  %s1426_s28 = smov 20  }
  0x93   :  { %393 = vrot.lane.b32.xlu2 %v1042_v7, %s1375_s5  ;;  %s1404_s5 = smov 42   ;;  %v1103_v7 = vld [vmem:[%s2392_s0 + $0x5] sm:$0x1]  }
  0x94   :  { %v91_v8 = vpop.permute.xlu0 %90   ;;  %v98_v9 = vpop.permute.xlu1 %97  }
  0x95   :  { %960 = vst.msk [vmem:[%s2393_s1 + $0x65] sm:$0x1] %vm3_vm0, %v91_v8   ;;  %v167_v12 = vpop.permute.xlu2 %166  }
  0x96   :  { %962 = vst.msk [vmem:[%s2393_s1 + $0x1e] sm:$0x1] %vm3_vm0, %v98_v9   ;;  %v619_v9 = vld [vmem:[%s2392_s0] sm:$0x1]  }
  0x97   :  { %981 = vst.msk [vmem:[%s2393_s1 + $0x58] sm:$0x1] %vm3_vm0, %v167_v12   ;;  %v1106_v12 = vld [vmem:[%s2392_s0 + $0x4] sm:$0x1]  }
  0x9a   :  { %400 = vrot.lane.b32.xlu0 %v1044_v10, %s1376_s14  ;;  %407 = vrot.lane.b32.xlu1 %v1046_v11, %s1377_s15  ;;  %s1382_s15 = smov 64   ;;  %s1429_s14 = smov 17  }
  0x9b   :  { %414 = vrot.lane.b32.xlu2 %v1048_v13, %s1378_s20  ;;  %s1407_s20 = smov 39   ;;  %v1108_v13 = vld [vmem:[%s2392_s0 + $0x8] sm:$0x1]  }
  0x9c   :  { %v112_v14 = vpop.permute.xlu0 %111   ;;  %v119_v15 = vpop.permute.xlu1 %118  }
  0x9d   :  { %966 = vst.msk [vmem:[%s2393_s1 + $0x10] sm:$0x1] %vm3_vm0, %v112_v14   ;;  %v187_v18 = vpop.permute.xlu2 %186  }
  0x9e   :  { %968 = vst.msk [vmem:[%s2393_s1 + $0x49] sm:$0x1] %vm3_vm0, %v119_v15   ;;  %v1110_v15 = vld [vmem:[%s2392_s0 + $0x3] sm:$0x1]  }
  0x9f   :  { %986 = vst.msk [vmem:[%s2393_s1 + $0x3] sm:$0x1] %vm3_vm0, %v187_v18   ;;  %v1112_v18 = vld [vmem:[%s2392_s0 + $0x7] sm:$0x1]  }
  0xa2   :  { %421 = vrot.lane.b32.xlu0 %v1050_v16, %s1379_s29  ;;  %428 = vrot.lane.b32.xlu1 %v1052_v17, %s1380_s30  ;;  %s1385_s30 = smov 61   ;;  %s1435_s29 = smov 6  }
  0xa3   :  { %434 = vrot.lane.b32.xlu2 %v433_v19, %s1381_s6  ;;  %s1410_s6 = smov 36   ;;  %v1114_v19 = vld [vmem:[%s2392_s0 + $0x2] sm:$0x1]  }
  0xa4   :  { %v132_v20 = vpop.permute.xlu0 %131   ;;  %v139_v21 = vpop.permute.xlu1 %138  }
  0xa5   :  { %971 = vst.msk [vmem:[%s2393_s1 + $0x3b] sm:$0x1] %vm3_vm0, %v132_v20   ;;  %v208_v24 = vpop.permute.xlu2 %207  }
  0xa6   :  { %973 = vst.msk [vmem:[%s2393_s1 + $0x74] sm:$0x1] %vm3_vm0, %v139_v21   ;;  %v1116_v21 = vld [vmem:[%s2392_s0 + $0x6] sm:$0x1]  }
  0xa7   :  { %992 = vst.msk [vmem:[%s2393_s1 + $0x2e] sm:$0x1] %vm3_vm0, %v208_v24   ;;  %v1118_v24 = vld [vmem:[%s2392_s0 + $0x1] sm:$0x1]  }
  0xaa   :  { %441 = vrot.lane.b32.xlu0 %v1055_v22, %s1382_s15  ;;  %448 = vrot.lane.b32.xlu1 %v1057_v23, %s1383_s16  ;;  %s1388_s16 = smov 58  }
  0xab   :  { %455 = vrot.lane.b32.xlu2 %v1059_v25, %s1384_s21  ;;  %s1413_s21 = smov 33   ;;  %v1120_v25 = vld [vmem:[%s2392_s0 + $0x5] sm:$0x1]  }
  0xac   :  { %v153_v26 = vpop.permute.xlu0 %152   ;;  %v160_v27 = vpop.permute.xlu1 %159  }
  0xad   :  { %977 = vst.msk [vmem:[%s2393_s1 + $0x66] sm:$0x1] %vm3_vm0, %v153_v26   ;;  %v229_v30 = vpop.permute.xlu2 %228  }
  0xae   :  { %979 = vst.msk [vmem:[%s2393_s1 + $0x1f] sm:$0x1] %vm3_vm0, %v160_v27   ;;  %v681_v27 = vld [vmem:[%s2392_s0] sm:$0x1]  }
  0xaf   :  { %998 = vst.msk [vmem:[%s2393_s1 + $0x59] sm:$0x1] %vm3_vm0, %v229_v30   ;;  %v1123_v30 = vld [vmem:[%s2392_s0 + $0x4] sm:$0x1]  }
  0xb2   :  { %462 = vrot.lane.b32.xlu0 %v1061_v28, %s1385_s30  ;;  %469 = vrot.lane.b32.xlu1 %v1063_v29, %s1386_s2  ;;  %s1391_s2 = smov 55  }
  0xb3   :  { %476 = vrot.lane.b32.xlu2 %v1065_v31, %s1387_s7  ;;  %s1416_s7 = smov 30   ;;  %v1125_v31 = vld [vmem:[%s2392_s0 + $0x8] sm:$0x1]  }
  0xb4   :  { %v174_v32 = vpop.permute.xlu0 %173   ;;  %v181_v33 = vpop.permute.xlu1 %180  }
  0xb5   :  { %983 = vst.msk [vmem:[%s2393_s1 + $0x11] sm:$0x1] %vm3_vm0, %v174_v32   ;;  %v249_v36 = vpop.permute.xlu2 %248  }
  0xb6   :  { %985 = vst.msk [vmem:[%s2393_s1 + $0x4a] sm:$0x1] %vm3_vm0, %v181_v33   ;;  %v1127_v33 = vld [vmem:[%s2392_s0 + $0x3] sm:$0x1]  }
  0xb7   :  { %1003 = vst.msk [vmem:[%s2393_s1 + $0x4] sm:$0x1] %vm3_vm0, %v249_v36   ;;  %v1129_v36 = vld [vmem:[%s2392_s0 + $0x7] sm:$0x1]  }
  0xba   :  { %483 = vrot.lane.b32.xlu0 %v1067_v34, %s1388_s16  ;;  %490 = vrot.lane.b32.xlu1 %v1069_v35, %s1389_s17  ;;  %s1394_s17 = smov 52  }
  0xbb   :  { %496 = vrot.lane.b32.xlu2 %v495_v37, %s1390_s22  ;;  %s1419_s22 = smov 27   ;;  %v1131_v37 = vld [vmem:[%s2392_s0 + $0x2] sm:$0x1]  }
  0xbc   :  { %v194_v38 = vpop.permute.xlu0 %193   ;;  %v201_v39 = vpop.permute.xlu1 %200  }
  0xbd   :  { %988 = vst.msk [vmem:[%s2393_s1 + $0x3c] sm:$0x1] %vm3_vm0, %v194_v38   ;;  %v270_v42 = vpop.permute.xlu2 %269  }
  0xbe   :  { %990 = vst.msk [vmem:[%s2393_s1 + $0x75] sm:$0x1] %vm3_vm0, %v201_v39   ;;  %v1133_v39 = vld [vmem:[%s2392_s0 + $0x6] sm:$0x1]  }
  0xbf   :  { %1009 = vst.msk [vmem:[%s2393_s1 + $0x2f] sm:$0x1] %vm3_vm0, %v270_v42   ;;  %v1135_v42 = vld [vmem:[%s2392_s0 + $0x1] sm:$0x1]  }
  0xc2   :  { %503 = vrot.lane.b32.xlu0 %v1072_v40, %s1391_s2  ;;  %510 = vrot.lane.b32.xlu1 %v1074_v41, %s1392_s3  ;;  %s1397_s3 = smov 49  }
  0xc3   :  { %517 = vrot.lane.b32.xlu2 %v1076_v43, %s1393_s8  ;;  %s1422_s8 = smov 24   ;;  %v1137_v43 = vld [vmem:[%s2392_s0 + $0x5] sm:$0x1]  }
  0xc4   :  { %v215_v44 = vpop.permute.xlu0 %214   ;;  %v222_v45 = vpop.permute.xlu1 %221  }
  0xc5   :  { %994 = vst.msk [vmem:[%s2393_s1 + $0x67] sm:$0x1] %vm3_vm0, %v215_v44   ;;  %v291_v48 = vpop.permute.xlu2 %290  }
  0xc6   :  { %996 = vst.msk [vmem:[%s2393_s1 + $0x20] sm:$0x1] %vm3_vm0, %v222_v45   ;;  %v743_v45 = vld [vmem:[%s2392_s0] sm:$0x1]  }
  0xc7   :  { %1015 = vst.msk [vmem:[%s2393_s1 + $0x5a] sm:$0x1] %vm3_vm0, %v291_v48   ;;  %v1140_v48 = vld [vmem:[%s2392_s0 + $0x4] sm:$0x1]  }
  0xca   :  { %524 = vrot.lane.b32.xlu0 %v1078_v46, %s1394_s17  ;;  %531 = vrot.lane.b32.xlu1 %v1080_v47, %s1395_s18  ;;  %s1400_s18 = smov 46   ;;  %s1433_s17 = smov 8  }
  0xcb   :  { %538 = vrot.lane.b32.xlu2 %v1082_v49, %s1396_s23  ;;  %s1425_s23 = smov 21   ;;  %v1142_v49 = vld [vmem:[%s2392_s0 + $0x8] sm:$0x1]  }
  0xcc   :  { %v236_v50 = vpop.permute.xlu0 %235   ;;  %v243_v51 = vpop.permute.xlu1 %242  }
  0xcd   :  { %1000 = vst.msk [vmem:[%s2393_s1 + $0x12] sm:$0x1] %vm3_vm0, %v236_v50   ;;  %v311_v54 = vpop.permute.xlu2 %310  }
  0xce   :  { %1002 = vst.msk [vmem:[%s2393_s1 + $0x4b] sm:$0x1] %vm3_vm0, %v243_v51   ;;  %v1144_v51 = vld [vmem:[%s2392_s0 + $0x3] sm:$0x1]  }
  0xcf   :  { %1020 = vst.msk [vmem:[%s2393_s1 + $0x5] sm:$0x1] %vm3_vm0, %v311_v54   ;;  %v1146_v54 = vld [vmem:[%s2392_s0 + $0x7] sm:$0x1]  }
  0xd2   :  { %545 = vrot.lane.b32.xlu0 %v1084_v52, %s1397_s3  ;;  %552 = vrot.lane.b32.xlu1 %v1086_v53, %s1398_s4  ;;  %s1403_s4 = smov 43   ;;  %s1441_s3 = smov 13  }
  0xd3   :  { %558 = vrot.lane.b32.xlu2 %v557_v55, %s1399_s9  ;;  %s1428_s9 = smov 18   ;;  %v1148_v55 = vld [vmem:[%s2392_s0 + $0x2] sm:$0x1]  }
  0xd4   :  { %v256_v56 = vpop.permute.xlu0 %255   ;;  %v263_v57 = vpop.permute.xlu1 %262  }
  0xd5   :  { %1005 = vst.msk [vmem:[%s2393_s1 + $0x3d] sm:$0x1] %vm3_vm0, %v256_v56   ;;  %v332_v60 = vpop.permute.xlu2 %331  }
  0xd6   :  { %1007 = vst.msk [vmem:[%s2393_s1 + $0x76] sm:$0x1] %vm3_vm0, %v263_v57   ;;  %v1150_v57 = vld [vmem:[%s2392_s0 + $0x6] sm:$0x1]  }
  0xd7   :  { %1026 = vst.msk [vmem:[%s2393_s1 + $0x30] sm:$0x1] %vm3_vm0, %v332_v60  }
  0xda   :  { %565 = vrot.lane.b32.xlu0 %v1089_v58, %s1400_s18  ;;  %572 = vrot.lane.b32.xlu1 %v1091_v59, %s1401_s19  ;;  %s1406_s19 = smov 40   ;;  %v1161_v58 = vld [vmem:[%s2392_s0 + $0x3] sm:$0x1]   ;;  %v1162_v59 = vld [vmem:[%s2392_s0 + $0x4] sm:$0x1]   ;;  %s1434_s18 = smov 7  }
  0xdb   :  { %579 = vrot.lane.b32.xlu2 %v1093_v61, %s1402_s24  ;;  %s1431_s24 = smov 15  }
  0xdc   :  { %v277_v62 = vpop.permute.xlu0 %276   ;;  %v284_v63 = vpop.permute.xlu1 %283  }
  0xdd   :  { %1011 = vst.msk [vmem:[%s2393_s1 + $0x68] sm:$0x1] %vm3_vm0, %v277_v62   ;;  %v353_v2 = vpop.permute.xlu2 %352   ;;  %v1165_v62 = vld [vmem:[%s2392_s0 + $0x7] sm:$0x1]  }
  0xde   :  { %1013 = vst.msk [vmem:[%s2393_s1 + $0x21] sm:$0x1] %vm3_vm0, %v284_v63   ;;  %v1166_v63 = vld [vmem:[%s2392_s0 + $0x8] sm:$0x1]  }
  0xdf   :  { %1032 = vst.msk [vmem:[%s2393_s1 + $0x5b] sm:$0x1] %vm3_vm0, %v353_v2  }
  0xe2   :  { %586 = vrot.lane.b32.xlu0 %v1095_v0, %s1403_s4  ;;  %593 = vrot.lane.b32.xlu1 %v1097_v1, %s1404_s5  ;;  %s1409_s5 = smov 37   ;;  %v830_v0 = vsel %vm829_vm1, %v1162_v59, %v1161_v58  ;;  %v844_v1 = vsel %vm843_vm2, %v1166_v63, %v1165_v62  ;;  %vm850_vm1 = vcmask 72760   ;;  %vm875_vm2 = vcmask 39936  }
  0xe3   :  { %600 = vrot.lane.b32.xlu2 %v1099_v3, %s1405_s10  ;;  %v1169_v3 = vld [vmem:[%s2392_s0 + $0x2] sm:$0x1]   ;;  %s1437_s10 = smov 4  }
  0xe4   :  { %v298_v4 = vpop.permute.xlu0 %297   ;;  %v305_v5 = vpop.permute.xlu1 %304  }
  0xe5   :  { %1017 = vst.msk [vmem:[%s2393_s1 + $0x13] sm:$0x1] %vm3_vm0, %v298_v4   ;;  %v373_v8 = vpop.permute.xlu2 %372   ;;  %v1170_v4 = vld [vmem:[%s2392_s0 + $0x3] sm:$0x1]  }
  0xe6   :  { %1019 = vst.msk [vmem:[%s2393_s1 + $0x4c] sm:$0x1] %vm3_vm0, %v305_v5   ;;  %v858_v5 = vsel %vm857_vm3, %v1170_v4, %v1169_v3  ;;  %vm878_vm3 = vcmask 72744  }
  0xe7   :  { %1037 = vst.msk [vmem:[%s2393_s1 + $0x6] sm:$0x1] %vm3_vm0, %v373_v8  }
  0xea   :  { %607 = vrot.lane.b32.xlu0 %v1101_v6, %s1406_s19  ;;  %614 = vrot.lane.b32.xlu1 %v1103_v7, %s1407_s20  ;;  %s1412_s20 = smov 34   ;;  %v1173_v6 = vld [vmem:[%s2392_s0 + $0x6] sm:$0x1]   ;;  %v1174_v7 = vld [vmem:[%s2392_s0 + $0x7] sm:$0x1]  }
  0xeb   :  { %620 = vrot.lane.b32.xlu2 %v619_v9, %s1408_s25  ;;  %s1445_s25 = smov 9  }
  0xec   :  { %v318_v10 = vpop.permute.xlu0 %317   ;;  %v325_v11 = vpop.permute.xlu1 %324  }
  0xed   :  { %1022 = vst.msk [vmem:[%s2393_s1 + $0x3e] sm:$0x1] %vm3_vm0, %v318_v10   ;;  %v394_v14 = vpop.permute.xlu2 %393   ;;  %v1177_v10 = vld [vmem:[%s2392_s0 + $0x1] sm:$0x1]  }
  0xee   :  { %1024 = vst.msk [vmem:[%s2393_s1 + $0x77] sm:$0x1] %vm3_vm0, %v325_v11   ;;  %v1178_v11 = vld [vmem:[%s2392_s0 + $0x2] sm:$0x1]  }
  0xef   :  { %1043 = vst.msk [vmem:[%s2393_s1 + $0x31] sm:$0x1] %vm3_vm0, %v394_v14  }
  0xf2   :  { %627 = vrot.lane.b32.xlu0 %v1106_v12, %s1409_s5  ;;  %634 = vrot.lane.b32.xlu1 %v1108_v13, %s1410_s6  ;;  %s1415_s6 = smov 31   ;;  %v872_v12 = vsel %vm871_vm4, %v1174_v7, %v1173_v6  ;;  %v886_v13 = vsel %vm885_vm5, %v1178_v11, %v1177_v10  ;;  %v2_v7 = vld [vmem:[%s2392_s0] sm:$0x1]   ;;  %vm889_vm4 = vcmask 31744   ;;  %vm892_vm5 = vcmask 72736  }
  0xf3   :  { %641 = vrot.lane.b32.xlu2 %v1110_v15, %s1411_s11  ;;  %v1181_v15 = vld [vmem:[%s2392_s0 + $0x5] sm:$0x1]   ;;  %4 = vst.msk [vmem:[%s2393_s1] sm:$0x1] %vm3_vm0, %v2_v7  }
  0xf4   :  { %v339_v16 = vpop.permute.xlu0 %338   ;;  %v346_v17 = vpop.permute.xlu1 %345  }
  0xf5   :  { %1028 = vst.msk [vmem:[%s2393_s1 + $0x69] sm:$0x1] %vm3_vm0, %v339_v16   ;;  %v415_v20 = vpop.permute.xlu2 %414   ;;  %v1182_v16 = vld [vmem:[%s2392_s0 + $0x6] sm:$0x1]  }
  0xf6   :  { %1030 = vst.msk [vmem:[%s2393_s1 + $0x22] sm:$0x1] %vm3_vm0, %v346_v17   ;;  %v900_v17 = vsel %vm899_vm6, %v1182_v16, %v1181_v15  ;;  %vm916_vm6 = vcmask 15360  }
  0xf7   :  { %1049 = vst.msk [vmem:[%s2393_s1 + $0x5c] sm:$0x1] %vm3_vm0, %v415_v20  }
  0xfa   :  { %648 = vrot.lane.b32.xlu0 %v1112_v18, %s1412_s20  ;;  %655 = vrot.lane.b32.xlu1 %v1114_v19, %s1413_s21  ;;  %s1418_s21 = smov 28   ;;  %v909_v18 = vld [vmem:[%s2392_s0] sm:$0x1]   ;;  %v1185_v19 = vld [vmem:[%s2392_s0 + $0x1] sm:$0x1]  }
  0xfb   :  { %662 = vrot.lane.b32.xlu2 %v1116_v21, %s1414_s26  ;;  %s1439_s26 = smov 2  }
  0xfc   :  { %v360_v22 = vpop.permute.xlu0 %359   ;;  %v367_v23 = vpop.permute.xlu1 %366  }
  0xfd   :  { %1034 = vst.msk [vmem:[%s2393_s1 + $0x14] sm:$0x1] %vm3_vm0, %v360_v22   ;;  %v435_v26 = vpop.permute.xlu2 %434   ;;  %v1188_v22 = vld [vmem:[%s2392_s0 + $0x4] sm:$0x1]  }
  0xfe   :  { %1036 = vst.msk [vmem:[%s2393_s1 + $0x4d] sm:$0x1] %vm3_vm0, %v367_v23   ;;  %v1189_v23 = vld [vmem:[%s2392_s0 + $0x5] sm:$0x1]  }
  0xff   :  { %1054 = vst.msk [vmem:[%s2393_s1 + $0x7] sm:$0x1] %vm3_vm0, %v435_v26  }
 0x102   :  { %669 = vrot.lane.b32.xlu0 %v1118_v24, %s1415_s6  ;;  %676 = vrot.lane.b32.xlu1 %v1120_v25, %s1416_s7  ;;  %s1421_s7 = smov 25   ;;  %v913_v24 = vsel %vm912_vm7, %v1185_v19, %v909_v18  ;;  %v927_v25 = vsel %vm926_vm8, %v1189_v23, %v1188_v22  ;;  %vm919_vm7 = vcmask 72720   ;;  %vm930_vm8 = vcmask 7168  }
 0x103   :  { %682 = vrot.lane.b32.xlu2 %v681_v27, %s1417_s12  ;;  %v1152_v27 = vld [vmem:[%s2392_s0 + $0x1] sm:$0x1]   ;;  %s1442_s12 = smov 12  }
 0x104   :  { %v380_v28 = vpop.permute.xlu0 %379   ;;  %v387_v29 = vpop.permute.xlu1 %386  }
 0x105   :  { %1039 = vst.msk [vmem:[%s2393_s1 + $0x3f] sm:$0x1] %vm3_vm0, %v380_v28   ;;  %v456_v32 = vpop.permute.xlu2 %455  }
 0x106   :  { %1041 = vst.msk [vmem:[%s2393_s1 + $0x78] sm:$0x1] %vm3_vm0, %v387_v29  }
 0x107   :  { %1060 = vst.msk [vmem:[%s2393_s1 + $0x32] sm:$0x1] %vm3_vm0, %v456_v32  }
 0x10a   :  { %689 = vrot.lane.b32.xlu0 %v1123_v30, %s1418_s21  ;;  %696 = vrot.lane.b32.xlu1 %v1125_v31, %s1419_s22  ;;  %s1424_s22 = smov 22   ;;  %s1438_s21 = smov 3   ;;  %v1154_v30 = vld [vmem:[%s2392_s0 + $0x5] sm:$0x1]   ;;  %v805_v31 = vld [vmem:[%s2392_s0] sm:$0x1]  }
 0x10b   :  { %703 = vrot.lane.b32.xlu2 %v1127_v33, %s1420_s27  ;;  %s1440_s27 = smov 1   ;;  %v1157_v33 = vld [vmem:[%s2392_s0 + $0x4] sm:$0x1]  }
 0x10c   :  { %v401_v34 = vpop.permute.xlu0 %400   ;;  %v408_v35 = vpop.permute.xlu1 %407  }
 0x10d   :  { %1045 = vst.msk [vmem:[%s2393_s1 + $0x6a] sm:$0x1] %vm3_vm0, %v401_v34   ;;  %v477_v38 = vpop.permute.xlu2 %476  }
 0x10e   :  { %1047 = vst.msk [vmem:[%s2393_s1 + $0x23] sm:$0x1] %vm3_vm0, %v408_v35  }
 0x10f   :  { %1066 = vst.msk [vmem:[%s2393_s1 + $0x5d] sm:$0x1] %vm3_vm0, %v477_v38  }
 0x112   :  { %710 = vrot.lane.b32.xlu0 %v1129_v36, %s1421_s7  ;;  %717 = vrot.lane.b32.xlu1 %v1131_v37, %s1422_s8  ;;  %s1427_s8 = smov 19   ;;  %v1159_v36 = vld [vmem:[%s2392_s0 + $0x8] sm:$0x1]  }
 0x113   :  { %724 = vrot.lane.b32.xlu2 %v1133_v39, %s1423_s13  ;;  %s1443_s13 = smov 11  }
 0x114   :  { %v422_v40 = vpop.permute.xlu0 %421   ;;  %v429_v41 = vpop.permute.xlu1 %428  }
 0x115   :  { %1051 = vst.msk [vmem:[%s2393_s1 + $0x15] sm:$0x1] %vm3_vm0, %v422_v40   ;;  %v497_v44 = vpop.permute.xlu2 %496  }
 0x116   :  { %1053 = vst.msk [vmem:[%s2393_s1 + $0x4e] sm:$0x1] %vm3_vm0, %v429_v41  }
 0x117   :  { %1071 = vst.msk [vmem:[%s2393_s1 + $0x8] sm:$0x1] %vm3_vm0, %v497_v44  }
 0x11a   :  { %731 = vrot.lane.b32.xlu0 %v1135_v42, %s1424_s22  ;;  %738 = vrot.lane.b32.xlu1 %v1137_v43, %s1425_s23  ;;  %s1430_s23 = smov 16  }
 0x11b   :  { %744 = vrot.lane.b32.xlu2 %v743_v45, %s1426_s28 }
 0x11c   :  { %v442_v46 = vpop.permute.xlu0 %441   ;;  %v449_v47 = vpop.permute.xlu1 %448  }
 0x11d   :  { %1056 = vst.msk [vmem:[%s2393_s1 + $0x40] sm:$0x1] %vm3_vm0, %v442_v46   ;;  %v518_v50 = vpop.permute.xlu2 %517  }
 0x11e   :  { %1058 = vst.msk [vmem:[%s2393_s1 + $0x79] sm:$0x1] %vm3_vm0, %v449_v47  }
 0x11f   :  { %1077 = vst.msk [vmem:[%s2393_s1 + $0x33] sm:$0x1] %vm3_vm0, %v518_v50  }
 0x122   :  { %751 = vrot.lane.b32.xlu0 %v1140_v48, %s1427_s8  ;;  %758 = vrot.lane.b32.xlu1 %v1142_v49, %s1428_s9  ;;  %s1432_s8 = smov 14   ;;  %s1436_s9 = smov 5  }
 0x123   :  { %765 = vrot.lane.b32.xlu2 %v1144_v51, %s1429_s14 }
 0x124   :  { %v463_v52 = vpop.permute.xlu0 %462   ;;  %v470_v53 = vpop.permute.xlu1 %469  }
 0x125   :  { %1062 = vst.msk [vmem:[%s2393_s1 + $0x6b] sm:$0x1] %vm3_vm0, %v463_v52   ;;  %v539_v56 = vpop.permute.xlu2 %538  }
 0x126   :  { %1064 = vst.msk [vmem:[%s2393_s1 + $0x24] sm:$0x1] %vm3_vm0, %v470_v53  }
 0x127   :  { %1083 = vst.msk [vmem:[%s2393_s1 + $0x5e] sm:$0x1] %vm3_vm0, %v539_v56  }
 0x12a   :  { %772 = vrot.lane.b32.xlu0 %v1146_v54, %s1430_s23  ;;  %779 = vrot.lane.b32.xlu1 %v1148_v55, %s1431_s24 }
 0x12b   :  { %786 = vrot.lane.b32.xlu2 %v1150_v57, %s1432_s8 }
 0x12c   :  { %v484_v60 = vpop.permute.xlu0 %483   ;;  %v491_v61 = vpop.permute.xlu1 %490  }
 0x12d   :  { %1068 = vst.msk [vmem:[%s2393_s1 + $0x16] sm:$0x1] %vm3_vm0, %v484_v60   ;;  %v559_v2 = vpop.permute.xlu2 %558  }
 0x12e   :  { %1070 = vst.msk [vmem:[%s2393_s1 + $0x4f] sm:$0x1] %vm3_vm0, %v491_v61  }
 0x12f   :  { %1088 = vst.msk [vmem:[%s2393_s1 + $0x9] sm:$0x1] %vm3_vm0, %v559_v2  }
 0x132   :  { %831 = vrot.lane.b32.xlu0 %v830_v0, %s1433_s17  ;;  %845 = vrot.lane.b32.xlu1 %v844_v1, %s1434_s18  ;;  %s1444_s18 = smov 10  }
 0x133   :  { %859 = vrot.lane.b32.xlu2 %v858_v5, %s1435_s29 }
 0x134   :  { %v504_v8 = vpop.permute.xlu0 %503   ;;  %v511_v9 = vpop.permute.xlu1 %510  }
 0x135   :  { %1073 = vst.msk [vmem:[%s2393_s1 + $0x41] sm:$0x1] %vm3_vm0, %v504_v8   ;;  %v580_v14 = vpop.permute.xlu2 %579  }
 0x136   :  { %1075 = vst.msk [vmem:[%s2393_s1 + $0x7a] sm:$0x1] %vm3_vm0, %v511_v9  }
 0x137   :  { %1094 = vst.msk [vmem:[%s2393_s1 + $0x34] sm:$0x1] %vm3_vm0, %v580_v14  }
 0x13a   :  { %873 = vrot.lane.b32.xlu0 %v872_v12, %s1436_s9  ;;  %887 = vrot.lane.b32.xlu1 %v886_v13, %s1437_s10 }
 0x13b   :  { %901 = vrot.lane.b32.xlu2 %v900_v17, %s1438_s21 }
 0x13c   :  { %v525_v20 = vpop.permute.xlu0 %524   ;;  %v532_v21 = vpop.permute.xlu1 %531  }
 0x13d   :  { %1079 = vst.msk [vmem:[%s2393_s1 + $0x6c] sm:$0x1] %vm3_vm0, %v525_v20   ;;  %v601_v26 = vpop.permute.xlu2 %600  }
 0x13e   :  { %1081 = vst.msk [vmem:[%s2393_s1 + $0x25] sm:$0x1] %vm3_vm0, %v532_v21  }
 0x13f   :  { %1100 = vst.msk [vmem:[%s2393_s1 + $0x5f] sm:$0x1] %vm3_vm0, %v601_v26  }
 0x142   :  { %914 = vrot.lane.b32.xlu0 %v913_v24, %s1439_s26  ;;  %928 = vrot.lane.b32.xlu1 %v927_v25, %s1440_s27 }
 0x143   :  { %793 = vrot.lane.b32.xlu2 %v1152_v27, %s1441_s3 }
 0x144   :  { %v546_v28 = vpop.permute.xlu0 %545   ;;  %v553_v29 = vpop.permute.xlu1 %552  }
 0x145   :  { %1085 = vst.msk [vmem:[%s2393_s1 + $0x17] sm:$0x1] %vm3_vm0, %v546_v28   ;;  %v621_v32 = vpop.permute.xlu2 %620  }
 0x146   :  { %1087 = vst.msk [vmem:[%s2393_s1 + $0x50] sm:$0x1] %vm3_vm0, %v553_v29  }
 0x147   :  { %1105 = vst.msk [vmem:[%s2393_s1 + $0xa] sm:$0x1] %vm3_vm0, %v621_v32  }
 0x14a   :  { %800 = vrot.lane.b32.xlu0 %v1154_v30, %s1442_s12  ;;  %806 = vrot.lane.b32.xlu1 %v805_v31, %s1443_s13 }
 0x14b   :  { %813 = vrot.lane.b32.xlu2 %v1157_v33, %s1444_s18 }
 0x14c   :  { %v566_v34 = vpop.permute.xlu0 %565   ;;  %v573_v35 = vpop.permute.xlu1 %572  }
 0x14d   :  { %1090 = vst.msk [vmem:[%s2393_s1 + $0x42] sm:$0x1] %vm3_vm0, %v566_v34   ;;  %v642_v37 = vpop.permute.xlu2 %641  }
 0x14e   :  { %1092 = vst.msk [vmem:[%s2393_s1 + $0x7b] sm:$0x1] %vm3_vm0, %v573_v35  }
 0x14f   :  { %1111 = vst.msk [vmem:[%s2393_s1 + $0x35] sm:$0x1] %vm3_vm0, %v642_v37  }
 0x152   :  { %820 = vrot.lane.b32.xlu0 %v1159_v36, %s1445_s25 }
 0x154   :  { %v587_v38 = vpop.permute.xlu0 %586   ;;  %v594_v39 = vpop.permute.xlu1 %593  }
 0x155   :  { %1096 = vst.msk [vmem:[%s2393_s1 + $0x6d] sm:$0x1] %vm3_vm0, %v587_v38   ;;  %v663_v40 = vpop.permute.xlu2 %662  }
 0x156   :  { %1098 = vst.msk [vmem:[%s2393_s1 + $0x26] sm:$0x1] %vm3_vm0, %v594_v39  }
 0x157   :  { %1117 = vst.msk [vmem:[%s2393_s1 + $0x60] sm:$0x1] %vm3_vm0, %v663_v40  }
 0x15c   :  { %v608_v41 = vpop.permute.xlu0 %607   ;;  %v615_v42 = vpop.permute.xlu1 %614  }
 0x15d   :  { %1102 = vst.msk [vmem:[%s2393_s1 + $0x18] sm:$0x1] %vm3_vm0, %v608_v41   ;;  %v683_v43 = vpop.permute.xlu2 %682  }
 0x15e   :  { %1104 = vst.msk [vmem:[%s2393_s1 + $0x51] sm:$0x1] %vm3_vm0, %v615_v42  }
 0x15f   :  { %1122 = vst.msk [vmem:[%s2393_s1 + $0xb] sm:$0x1] %vm3_vm0, %v683_v43  }
 0x164   :  { %v628_v44 = vpop.permute.xlu0 %627   ;;  %v635_v45 = vpop.permute.xlu1 %634  }
 0x165   :  { %1107 = vst.msk [vmem:[%s2393_s1 + $0x43] sm:$0x1] %vm3_vm0, %v628_v44   ;;  %v704_v46 = vpop.permute.xlu2 %703  }
 0x166   :  { %1109 = vst.msk [vmem:[%s2393_s1 + $0x7c] sm:$0x1] %vm3_vm0, %v635_v45  }
 0x167   :  { %1128 = vst.msk [vmem:[%s2393_s1 + $0x36] sm:$0x1] %vm3_vm0, %v704_v46  }
 0x16c   :  { %v649_v47 = vpop.permute.xlu0 %648   ;;  %v656_v48 = vpop.permute.xlu1 %655  }
 0x16d   :  { %1113 = vst.msk [vmem:[%s2393_s1 + $0x6e] sm:$0x1] %vm3_vm0, %v649_v47   ;;  %v725_v49 = vpop.permute.xlu2 %724  }
 0x16e   :  { %1115 = vst.msk [vmem:[%s2393_s1 + $0x27] sm:$0x1] %vm3_vm0, %v656_v48  }
 0x16f   :  { %1134 = vst.msk [vmem:[%s2393_s1 + $0x61] sm:$0x1] %vm3_vm0, %v725_v49  }
 0x174   :  { %v670_v50 = vpop.permute.xlu0 %669   ;;  %v677_v51 = vpop.permute.xlu1 %676  }
 0x175   :  { %1119 = vst.msk [vmem:[%s2393_s1 + $0x19] sm:$0x1] %vm3_vm0, %v670_v50   ;;  %v745_v52 = vpop.permute.xlu2 %744  }
 0x176   :  { %1121 = vst.msk [vmem:[%s2393_s1 + $0x52] sm:$0x1] %vm3_vm0, %v677_v51  }
 0x177   :  { %1139 = vst.msk [vmem:[%s2393_s1 + $0xc] sm:$0x1] %vm3_vm0, %v745_v52  }
 0x17c   :  { %v690_v53 = vpop.permute.xlu0 %689   ;;  %v697_v54 = vpop.permute.xlu1 %696  }
 0x17d   :  { %1124 = vst.msk [vmem:[%s2393_s1 + $0x44] sm:$0x1] %vm3_vm0, %v690_v53   ;;  %v766_v55 = vpop.permute.xlu2 %765  }
 0x17e   :  { %1126 = vst.msk [vmem:[%s2393_s1 + $0x7d] sm:$0x1] %vm3_vm0, %v697_v54  }
 0x17f   :  { %1145 = vst.msk [vmem:[%s2393_s1 + $0x37] sm:$0x1] %vm3_vm0, %v766_v55  }
 0x184   :  { %v711_v56 = vpop.permute.xlu0 %710   ;;  %v718_v57 = vpop.permute.xlu1 %717  }
 0x185   :  { %1130 = vst.msk [vmem:[%s2393_s1 + $0x6f] sm:$0x1] %vm3_vm0, %v711_v56   ;;  %v787_v58 = vpop.permute.xlu2 %786  }
 0x186   :  { %1132 = vst.msk [vmem:[%s2393_s1 + $0x28] sm:$0x1] %vm3_vm0, %v718_v57  }
 0x187   :  { %1151 = vst.msk [vmem:[%s2393_s1 + $0x62] sm:$0x1] %vm3_vm0, %v787_v58  }
 0x18c   :  { %v732_v59 = vpop.permute.xlu0 %731   ;;  %v739_v60 = vpop.permute.xlu1 %738  }
 0x18d   :  { %1136 = vst.msk [vmem:[%s2393_s1 + $0x1a] sm:$0x1] %vm3_vm0, %v732_v59   ;;  %v860_v61 = vpop.permute.xlu2 %859  }
 0x18e   :  { %1138 = vst.msk [vmem:[%s2393_s1 + $0x53] sm:$0x1] %vm3_vm0, %v739_v60  }
 0x18f   :  { %1171 = vst.msk [vmem:[%s2393_s1 + $0x2a] sm:$0x1] %vm861_vm9, %v860_v61   ;;  %vm933_vm9 = vcmask 72712  }
 0x190   :  { %1172 = vst.msk [vmem:[%s2393_s1 + $0x2a] sm:$0x1] %vm864_vm10, %v860_v61  }
 0x194   :  { %v752_v62 = vpop.permute.xlu0 %751   ;;  %v759_v63 = vpop.permute.xlu1 %758  }
 0x195   :  { %1141 = vst.msk [vmem:[%s2393_s1 + $0x45] sm:$0x1] %vm3_vm0, %v752_v62   ;;  %v902_v0 = vpop.permute.xlu2 %901  }
 0x196   :  { %1143 = vst.msk [vmem:[%s2393_s1 + $0x7e] sm:$0x1] %vm3_vm0, %v759_v63  }
 0x197   :  { %1183 = vst.msk [vmem:[%s2393_s1 + $0x55] sm:$0x1] %vm903_vm11, %v902_v0  }
 0x198   :  { %1184 = vst.msk [vmem:[%s2393_s1 + $0x55] sm:$0x1] %vm906_vm12, %v902_v0  }
 0x19c   :  { %v773_v1 = vpop.permute.xlu0 %772   ;;  %v780_v2 = vpop.permute.xlu1 %779  }
 0x19d   :  { %1147 = vst.msk [vmem:[%s2393_s1 + $0x70] sm:$0x1] %vm3_vm0, %v773_v1   ;;  %v794_v3 = vpop.permute.xlu2 %793  }
 0x19e   :  { %1149 = vst.msk [vmem:[%s2393_s1 + $0x29] sm:$0x1] %vm3_vm0, %v780_v2  }
 0x19f   :  { %1153 = vst.msk [vmem:[%s2393_s1 + $0x1b] sm:$0x1] %vm3_vm0, %v794_v3  }
 0x1a4   :  { %v832_v4 = vpop.permute.xlu0 %831   ;;  %v846_v5 = vpop.permute.xlu1 %845  }
 0x1a5   :  { %1163 = vst.msk [vmem:[%s2393_s1 + $0x38] sm:$0x1] %vm833_vm13, %v832_v4   ;;  %v814_v6 = vpop.permute.xlu2 %813  }
 0x1a6   :  { %1164 = vst.msk [vmem:[%s2393_s1 + $0x38] sm:$0x1] %vm836_vm14, %v832_v4  }
 0x1a7   :  { %1167 = vst.msk [vmem:[%s2393_s1 + $0x71] sm:$0x1] %vm847_vm15, %v846_v5  }
 0x1a8   :  { %1168 = vst.msk [vmem:[%s2393_s1 + $0x71] sm:$0x1] %vm850_vm1, %v846_v5  }
 0x1a9   :  { %1158 = vst.msk [vmem:[%s2393_s1 + $0x46] sm:$0x1] %vm3_vm0, %v814_v6  }
 0x1ac   :  { %v874_v8 = vpop.permute.xlu0 %873   ;;  %v888_v9 = vpop.permute.xlu1 %887  }
 0x1ad   :  { %1175 = vst.msk [vmem:[%s2393_s1 + $0x63] sm:$0x1] %vm875_vm2, %v874_v8  }
 0x1ae   :  { %1176 = vst.msk [vmem:[%s2393_s1 + $0x63] sm:$0x1] %vm878_vm3, %v874_v8  }
 0x1af   :  { %1179 = vst.msk [vmem:[%s2393_s1 + $0x1c] sm:$0x1] %vm889_vm4, %v888_v9  }
 0x1b0   :  { %1180 = vst.msk [vmem:[%s2393_s1 + $0x1c] sm:$0x1] %vm892_vm5, %v888_v9  }
 0x1b4   :  { %v915_v10 = vpop.permute.xlu0 %914   ;;  %v929_v11 = vpop.permute.xlu1 %928  }
 0x1b5   :  { %1186 = vst.msk [vmem:[%s2393_s1 + $0xe] sm:$0x1] %vm916_vm6, %v915_v10  }
 0x1b6   :  { %1187 = vst.msk [vmem:[%s2393_s1 + $0xe] sm:$0x1] %vm919_vm7, %v915_v10  }
 0x1b7   :  { %1190 = vst.msk [vmem:[%s2393_s1 + $0x47] sm:$0x1] %vm930_vm8, %v929_v11  }
 0x1b8   :  { %1191 = vst.msk [vmem:[%s2393_s1 + $0x47] sm:$0x1] %vm933_vm9, %v929_v11  }
 0x1bc   :  { %v801_v12 = vpop.permute.xlu0 %800   ;;  %v807_v13 = vpop.permute.xlu1 %806  }
 0x1bd   :  { %1155 = vst.msk [vmem:[%s2393_s1 + $0x54] sm:$0x1] %vm3_vm0, %v801_v12  }
 0x1be   :  { %1156 = vst.msk [vmem:[%s2393_s1 + $0xd] sm:$0x1] %vm3_vm0, %v807_v13  }
 0x1c4   :  { %v821_v14 = vpop.permute.xlu0 %820  }
 0x1c5   :  { %1160 = vst.msk [vmem:[%s2393_s1 + $0x7f] sm:$0x1] %vm3_vm0, %v821_v14  }

// kernel: dpcnn_forward.1
= control target key start
LH: loop header
LB: loop body
LE: loop exit
PB: predicated region body
PF: predicated region fallthrough
CT: control target
= control target key end

     0   :  { %s1415_s9 = smov 0   ;;  %s1417_s10 = smov 0   ;;  %s2150_s0 = inlined_call_operand.vmem [shape: f32[16,1152], index: 0, kind: input, shape index: {}]   ;;  %s2151_s1 = inlined_call_operand.vmem [shape: f32[136,384], index: 1, kind: input, shape index: {}]   ;;  %s2152_s2 = inlined_call_operand.vmem [shape: f32[1,1152], index: 2, kind: output, shape index: {}]  }
   0x1   :  { %s1419_s11 = smov 0  }
   0x2 LB: > { %s1322_s12 = sadd.s32 4294967295, %s1398_s11   ;;  %s1432_s13 = sadd.s32 1, %s1398_s11   ;;  %s1398_s11 = sphi %s1419_s11, %s2155_s11   ;;  %s1394_s10 = sphi %s1417_s10, %s2154_s10   ;;  %s1390_s9 = sphi %s1415_s9, %s2153_s9  }
   0x3   : > { %s16_s14 = ssub.s32 %s1398_s11, %s1432_s13  ;;  %s19_s15 = sadd.s32 1, %s1394_s10 }
   0x4   : > { %p17_p0 = scmp.eq.s32.totalorder %s16_s14, 0  ;;  %p26_p1 = scmp.ne.s32.totalorder %s1394_s10, %s1390_s9 }
   0x5   : > { %p27_p2 = scmp.eq.s32.totalorder %s1398_s11, 0  ;;  %p1325_p4 = scmp.ge.s32.totalorder %s1398_s11, 3 }
   0x6   : > { %s1441_s16 = scalar_select %p17_p0, %s1394_s10, %s19_s15  }
   0x7   : > { %p28_p3 = por %p27_p2, %p26_p1  ;;  %102 = sbr.rel (%p1325_p4) target bundleno = 23 (0x17), region = 20 }
   0xc   : > { %105 = sbr.rel (!%p28_p3) target bundleno = 23 (0x17), region = 24  ;;  %s107_s17 = sand.u32 (%p28_p3), 1, %s1394_s10  }
   0xd   : > { %s1349_s18 = smul.u32 (%p28_p3), 24, %s1398_s11 }
   0xe   : > { %s1350_s19 = smul.u32 (%p28_p3), 48, %s107_s17 }
   0xf   : > { %s112_s22 = scalar_lea.vmem (%p28_p3), %s2150_s0, %s1349_s18 }
  0x10   : > { %v125_v0 = vld [vmem:[%s112_s22] sm:$0xff] (%p28_p3)  ;;  %v127_v1 = vld [vmem:[%s112_s22 + $0x8] sm:$0xff] (%p28_p3)  ;;  %v129_v2 = vld [vmem:[%s112_s22 + $0x10] sm:$0xff] (%p28_p3)  ;;  %s109_s23 = scalar_lea.vmem (%p28_p3), [#allocation3], %s1350_s19 }
  0x11   : > { %126 = vst [vmem:[%s109_s23] sm:$0xff] %v125_v0  ;;  %v131_v3 = vld [vmem:[%s112_s22 + $0x48] sm:$0xff]  ;;  %v133_v4 = vld [vmem:[%s112_s22 + $0x50] sm:$0xff]  ;;  %v135_v5 = vld [vmem:[%s112_s22 + $0x58] sm:$0xff] }
  0x12   : > { %128 = vst [vmem:[%s109_s23 + $0x8] sm:$0xff] %v127_v1 }
  0x13   : > { %130 = vst [vmem:[%s109_s23 + $0x10] sm:$0xff] %v129_v2 }
  0x14   : > { %132 = vst [vmem:[%s109_s23 + $0x18] sm:$0xff] %v131_v3 }
  0x15   : > { %134 = vst [vmem:[%s109_s23 + $0x20] sm:$0xff] %v133_v4 }
  0x16   : > { %136 = vst [vmem:[%s109_s23 + $0x28] sm:$0xff] %v135_v5 }
  0x17 PF: > { %p1327_p5 = scmp.ge.s32.totalorder %s1398_s11, 1  ;;  %p141_p6 = scmp.lt.s32.totalorder %s1398_s11, 4 }
  0x19   : > { %p142_p7 = pnand %p1327_p5, %p141_p6 }
  0x1a   : > { %s148_s24 = sand.u32 (!%p142_p7), 1, %s1390_s9   ;;  %s169_s14 = smul.u32 (!%p142_p7), 3, %s1322_s12 }
  0x1b   : > { %145 = sbr.rel (%p142_p7) target bundleno = 264 (0x108), region = 47 }
  0x1c   : > { %s1351_s25 = smul.u32 (!%p142_p7), 48, %s148_s24  ;;  %p170_p8 = scmp.lt.s32.totalorder (!%p142_p7), %s169_s14, 8 }
  0x1e   : > { %s1452_s26 = scalar_lea.vmem (!%p142_p7), [#allocation3], %s1351_s25 }
  0x20   : > { %v1455_v6 = vld [vmem:[%s1452_s26] ss:$8 sm:$0x7]  ;;  %v177_v8 = vld [vmem:[%s2151_s1] sm:$0xe0]  ;;  %vm323_vm0 = vcmask 1043456  }
  0x21   : > { %v174_v7 = vld [vmem:[%s2151_s1] sm:$0x1f]  ;;  %v180_v9 = vld [vmem:[%s2151_s1 + $0x18] sm:$0x3]  ;;  %v183_v11 = vld [vmem:[%s2151_s1 + $0x18] sm:$0x7c] }
  0x22   : > { %v1467_v10 = vld [vmem:[%s1452_s26 + $0x1] ss:$8 sm:$0x7]  ;;  %v192_v12 = vld [vmem:[%s2151_s1 + $0x30] sm:$0xf0]  ;;  %v251_v13 = vperm.slane %v1455_v6, 0 }
  0x23   : > { %v263_v14 = vperm.slane %v1467_v10, 0  ;;  %v1478_v15 = vld [vmem:[%s1452_s26 + $0x2] ss:$8 sm:$0x7]  ;;  %v186_v16 = vld [vmem:[%s2151_s1 + $0x18] sm:$0x80] }
  0x24   : > { %v189_v17 = vld [vmem:[%s2151_s1 + $0x30] sm:$0xf]  ;;  %v195_v18 = vld [vmem:[%s2151_s1 + $0x48] sm:$0x1]  ;;  %v278_v19 = vperm.slane %v1478_v15, 0  ;;  %v257_v28 = vmul.f32 %v251_v13, %v174_v7  ;;  %vm633_vm1 = vcmask 1042432  }
  0x25   : > { %v1491_v20 = vld [vmem:[%s1452_s26 + $0x3] ss:$8 sm:$0x7]  ;;  %v1498_v23 = vld [vmem:[%s1452_s26 + $0x4] ss:$8 sm:$0x7]  ;;  %v269_v29 = vmul.f32 %v263_v14, %v177_v8  ;;  %v272_v30 = vmul.f32 %v263_v14, %v180_v9 }
  0x26   : > { %v198_v21 = vld [vmem:[%s2151_s1 + $0x48] sm:$0x3e]  ;;  %v290_v22 = vperm.slane %v1491_v20, 0  ;;  %v201_v24 = vld [vmem:[%s2151_s1 + $0x48] sm:$0xc0]  ;;  %v305_v25 = vperm.slane %v1498_v23, 0  ;;  %v284_v34 = vmul.f32 %v278_v19, %v183_v11 }
  0x27   : > { %v1505_v26 = vld [vmem:[%s1452_s26 + $0x5] ss:$8 sm:$0x7]  ;;  %v204_v27 = vld [vmem:[%s2151_s1 + $0x60] sm:$0x7]  ;;  %vm667_vm2 = vcmask 1040384  }
  0x28   : > { %v342_v31 = vperm.slane %v1505_v26, 0  ;;  %v1512_v32 = vld [vmem:[%s1452_s26 + $0x6] ss:$8 sm:$0x7]  ;;  %v311_v35 = vmul.f32 %v305_v25, %v192_v12  ;;  %v314_v36 = vmul.f32 %v305_v25, %v195_v18  ;;  %v210_v39 = vld [vmem:[%s2151_s1 + $0x78] sm:$0x1f]  ;;  %v296_v42 = vmul.f32 %v290_v22, %v186_v16 }
  0x29   : > { %v207_v33 = vld [vmem:[%s2151_s1 + $0x60] sm:$0xf8]  ;;  %v369_v37 = vperm.slane %v1512_v32, 0  ;;  %v213_v40 = vld [vmem:[%s2151_s1 + $0x78] sm:$0xe0]  ;;  %v299_v43 = vmul.f32 %v290_v22, %v189_v17  ;;  %vm875_vm3 = vcmask 1046528  }
  0x2a   : > { %v1519_v38 = vld [vmem:[%s1452_s26 + $0x7] ss:$8 sm:$0x7]  ;;  %v216_v41 = vld [vmem:[%s2151_s1 + $0x90] sm:$0x3]  ;;  %v348_v44 = vmul.f32 %v342_v31, %v198_v21  ;;  %v324_v48 = vrot.slane %v311_v35, 4 }
  0x2b   : > { %v405_v45 = vperm.slane %v1519_v38, 0  ;;  %v1532_v46 = vld [vmem:[%s1452_s26 + $0x18] ss:$8 sm:$0x7]  ;;  %v219_v47 = vld [vmem:[%s2151_s1 + $0x90] sm:$0x7c]  ;;  %v375_v50 = vmul.f32 %v369_v37, %v201_v24  ;;  %v378_v51 = vmul.f32 %v369_v37, %v204_v27 }
  0x2c   : > { %v325_v49 = vrot.slane %v314_v36, 4  ;;  %v1538_v52 = vld [vmem:[%s1452_s26 + $0x19] ss:$8 sm:$0x7]  ;;  %v354_v53 = vrot.slane %v348_v44, 4  ;;  %v432_v55 = vperm.slane %v1532_v46, 0 }
  0x2d   : > { %v411_v54 = vmul.f32 %v405_v45, %v207_v33  ;;  %v447_v56 = vperm.slane %v1538_v52, 0  ;;  %v1543_v57 = vld [vmem:[%s1452_s26 + $0x1a] ss:$8 sm:$0x7]  ;;  %v387_v59 = vrot.slane %v375_v50, 4  ;;  %v388_v60 = vrot.slane %v378_v51, 4 }
  0x2e   : > { %v326_v58 = vsel %vm323_vm0, %v324_v48, %v325_v49  ;;  %v468_v61 = vperm.slane %v1543_v57, 0  ;;  %v1548_v62 = vld [vmem:[%s1452_s26 + $0x1b] ss:$8 sm:$0x7]  ;;  %v222_v63 = vld [vmem:[%s2151_s1 + $0x90] sm:$0x80]  ;;  %v360_v2 = vadd.f32 %v354_v53, %v269_v29  ;;  %v363_v3 = vadd.f32 %v354_v53, %v272_v30 }
  0x2f   : > { %v225_v0 = vld [vmem:[%s2151_s1 + $0xa8] sm:$0xf]  ;;  %v336_v1 = vadd.f32 %v326_v58, %v257_v28  ;;  %v417_v4 = vrot.slane %v411_v54, 4  ;;  %v1557_v5 = vld [vmem:[%s1452_s26 + $0x1c] ss:$8 sm:$0x7]  ;;  %v389_v9 = vsel %vm323_vm0, %v387_v59, %v388_v60  ;;  %v438_v11 = vmul.f32 %v432_v55, %v210_v39 }
  0x30   : > { %v228_v7 = vld [vmem:[%s2151_s1 + $0xa8] sm:$0xf0]  ;;  %v231_v8 = vld [vmem:[%s2151_s1 + $0xc0] sm:$0x1]  ;;  %v453_v12 = vmul.f32 %v447_v56, %v213_v40  ;;  %v456_v13 = vmul.f32 %v447_v56, %v216_v41  ;;  %v234_v17 = vld [vmem:[%s2151_s1 + $0xc0] sm:$0x3e]  ;;  %v399_v18 = vadd.f32 %v389_v9, %v284_v34  ;;  %v474_v22 = vmul.f32 %v468_v61, %v219_v47 }
  0x31   : > { %v1567_v14 = vld [vmem:[%s1452_s26 + $0x1d] ss:$8 sm:$0x7]  ;;  %v1570_v16 = vld [vmem:[%s1452_s26 + $0x1e] ss:$8 sm:$0x7]  ;;  %v423_v19 = vadd.f32 %v417_v4, %v296_v42  ;;  %v426_v21 = vadd.f32 %v417_v4, %v299_v43  ;;  %v441_v28 = vadd.f32 %v438_v11, %v336_v1 }
  0x32   : > { %v1576_v24 = vld [vmem:[%s1452_s26 + $0x1f] ss:$8 sm:$0x7]  ;;  %v240_v27 = vld [vmem:[%s2151_s1 + $0xd8] sm:$0x7]  ;;  %v459_v29 = vadd.f32 %v453_v12, %v360_v2  ;;  %v462_v30 = vadd.f32 %v456_v13, %v363_v3  ;;  %v483_v31 = vperm.slane %v1548_v62, 0  ;;  %v477_v34 = vadd.f32 %v474_v22, %v399_v18 }
  0x33   : > { %v237_v25 = vld [vmem:[%s2151_s1 + $0xc0] sm:$0xc0]  ;;  %v243_v33 = vld [vmem:[%s2151_s1 + $0xd8] sm:$0xf8]  ;;  %v504_v35 = vperm.slane %v1557_v5, 0  ;;  %v540_v36 = vperm.slane %v1567_v14, 0 }
  0x34   : > { %v567_v37 = vperm.slane %v1570_v16, 0  ;;  %v489_v39 = vmul.f32 %v483_v31, %v222_v63  ;;  %v492_v40 = vmul.f32 %v483_v31, %v225_v0  ;;  %v603_v41 = vperm.slane %v1576_v24, 0  ;;  %v175_v48 = vld [vmem:[%s2151_s1 + $0x8] sm:$0x1f]  ;;  %v178_v61 = vld [vmem:[%s2151_s1 + $0x8] sm:$0xe0] }
  0x35   : > { %v252_v42 = vperm.slane %v1455_v6, 1  ;;  %v510_v43 = vmul.f32 %v504_v35, %v228_v7  ;;  %v513_v44 = vmul.f32 %v504_v35, %v231_v8  ;;  %v546_v45 = vmul.f32 %v540_v36, %v234_v17  ;;  %v181_v3 = vld [vmem:[%s2151_s1 + $0x20] sm:$0x3]  ;;  %v184_v12 = vld [vmem:[%s2151_s1 + $0x20] sm:$0x7c]  ;;  %s2157_s14 = smov (!%p170_p8, %s169_s14), 8 }
  0x36   : > { %v573_v47 = vmul.f32 %v567_v37, %v237_v25  ;;  %v495_v49 = vadd.f32 %v489_v39, %v423_v19  ;;  %v498_v50 = vadd.f32 %v492_v40, %v426_v21  ;;  %v576_v51 = vmul.f32 %v567_v37, %v240_v27  ;;  %v187_v13 = vld [vmem:[%s2151_s1 + $0x20] sm:$0x80]  ;;  %v190_v21 = vld [vmem:[%s2151_s1 + $0x38] sm:$0xf]  ;;  %v193_v22 = vld [vmem:[%s2151_s1 + $0x38] sm:$0xf0]  ;;  %s172_s24 = scalar_lea.vmem %s2152_s2, %s2157_s14 }
  0x37   : > { %v609_v53 = vmul.f32 %v603_v41, %v243_v33  ;;  %v522_v54 = vrot.slane %v510_v43, 4  ;;  %v523_v55 = vrot.slane %v513_v44, 4  ;;  %v552_v56 = vrot.slane %v546_v45, 4  ;;  %v199_v35 = vld [vmem:[%s2151_s1 + $0x50] sm:$0x3e] }
  0x38   : > { %v585_v58 = vrot.slane %v573_v47, 4  ;;  %v586_v59 = vrot.slane %v576_v51, 4  ;;  %v258_v63 = vmul.f32 %v252_v42, %v175_v48  ;;  %v264_v4 = vperm.slane %v1467_v10, 1  ;;  %v202_v43 = vld [vmem:[%s2151_s1 + $0x50] sm:$0xc0] }
  0x39   : > { %v615_v60 = vrot.slane %v609_v53, 4  ;;  %v524_v0 = vsel %vm323_vm0, %v522_v54, %v523_v55  ;;  %v558_v1 = vadd.f32 %v552_v56, %v459_v29  ;;  %v561_v2 = vadd.f32 %v552_v56, %v462_v30  ;;  %v196_v29 = vld [vmem:[%s2151_s1 + $0x50] sm:$0x1]  ;;  %v205_v44 = vld [vmem:[%s2151_s1 + $0x68] sm:$0x7] }
  0x3a   : > { %v534_v7 = vadd.f32 %v524_v0, %v441_v28  ;;  %v587_v8 = vsel %vm323_vm0, %v585_v58, %v586_v59  ;;  %v270_v25 = vmul.f32 %v264_v4, %v178_v61  ;;  %v273_v30 = vmul.f32 %v264_v4, %v181_v3  ;;  %v208_v45 = vld [vmem:[%s2151_s1 + $0x68] sm:$0xf8]  ;;  %v211_v53 = vld [vmem:[%s2151_s1 + $0x80] sm:$0x1f]  ;;  %v214_v54 = vld [vmem:[%s2151_s1 + $0x80] sm:$0xe0] }
  0x3b   : > { %v621_v9 = vadd.f32 %v615_v60, %v495_v49  ;;  %v624_v11 = vadd.f32 %v615_v60, %v498_v50  ;;  %v597_v17 = vadd.f32 %v587_v8, %v477_v34  ;;  %v634_v18 = vrot.slane %v558_v1, 5  ;;  %v246_v59 = vld [vmem:[%s2151_s1 + $0xf0] sm:$0x1f]  ;;  %v217_v3 = vld [vmem:[%s2151_s1 + $0x98] sm:$0x3] }
  0x3c   : > { %v635_v19 = vrot.slane %v561_v2, 5  ;;  %v279_v31 = vperm.slane %v1478_v15, 1  ;;  %v291_v36 = vperm.slane %v1491_v20, 1  ;;  %v306_v37 = vperm.slane %v1498_v23, 1 }
  0x3d   : > { %v668_v27 = vrot.slane %v621_v9, 7  ;;  %v669_v28 = vrot.slane %v624_v11, 7  ;;  %v652_v34 = vrot.slane %v597_v17, 2  ;;  %v343_v42 = vperm.slane %v1505_v26, 1 }
  0x3e   : > { %v636_v33 = vsel %vm633_vm1, %v634_v18, %v635_v19  ;;  %v285_v41 = vmul.f32 %v279_v31, %v184_v12  ;;  %v297_v47 = vmul.f32 %v291_v36, %v187_v13  ;;  %v300_v48 = vmul.f32 %v291_v36, %v190_v21  ;;  %v220_v18 = vld [vmem:[%s2151_s1 + $0x98] sm:$0x7c]  ;;  %v229_v36 = vld [vmem:[%s2151_s1 + $0xb0] sm:$0xf0] }
  0x3f   : > { %v646_v39 = vadd.f32 %v636_v33, %v534_v7  ;;  %v670_v40 = vsel %vm667_vm2, %v668_v27, %v669_v28  ;;  %v312_v49 = vmul.f32 %v306_v37, %v193_v22  ;;  %v315_v50 = vmul.f32 %v306_v37, %v196_v29  ;;  %v223_v27 = vld [vmem:[%s2151_s1 + $0x98] sm:$0x80]  ;;  %v232_v37 = vld [vmem:[%s2151_s1 + $0xc8] sm:$0x1] }
  0x40   : > { %v349_v55 = vmul.f32 %v343_v42, %v199_v35  ;;  %v370_v56 = vperm.slane %v1512_v32, 1  ;;  %v406_v58 = vperm.slane %v1519_v38, 1  ;;  %v433_v0 = vperm.slane %v1532_v46, 1  ;;  %v226_v35 = vld [vmem:[%s2151_s1 + $0xb0] sm:$0xf] }
  0x41   : > { %v658_v51 = vadd.f32 %v652_v34, %v646_v39  ;;  %v327_v60 = vrot.slane %v312_v49, 4  ;;  %v328_v61 = vrot.slane %v315_v50, 4  ;;  %v448_v1 = vperm.slane %v1538_v52, 1  ;;  %v235_v39 = vld [vmem:[%s2151_s1 + $0xc8] sm:$0x3e] }
  0x42   : > { %v355_v4 = vrot.slane %v349_v55, 4  ;;  %v376_v7 = vmul.f32 %v370_v56, %v202_v43  ;;  %v379_v8 = vmul.f32 %v370_v56, %v205_v44  ;;  %v412_v11 = vmul.f32 %v406_v58, %v208_v45  ;;  %v241_v49 = vld [vmem:[%s2151_s1 + $0xe0] sm:$0x7]  ;;  %v244_v55 = vld [vmem:[%s2151_s1 + $0xe0] sm:$0xf8] }
  0x43   : > { %v680_v2 = vadd.f32 %v670_v40, %v658_v51  ;;  %v329_v9 = vsel %vm323_vm0, %v327_v60, %v328_v61  ;;  %v439_v12 = vmul.f32 %v433_v0, %v211_v53  ;;  %v454_v13 = vmul.f32 %v448_v1, %v214_v54  ;;  %v238_v40 = vld [vmem:[%s2151_s1 + $0xc8] sm:$0xc0] }
  0x44   : > { %v337_v19 = vadd.f32 %v329_v9, %v258_v63  ;;  %v361_v21 = vadd.f32 %v355_v4, %v270_v25  ;;  %v364_v22 = vadd.f32 %v355_v4, %v273_v30  ;;  %v390_v28 = vrot.slane %v376_v7, 4  ;;  %v176_v4 = vld [vmem:[%s2151_s1 + $0x10] sm:$0x1f] }
  0x45   : > { %v683_v17 = vadd.f32 %v680_v2, %v246_v59  ;;  %v391_v29 = vrot.slane %v379_v8, 4  ;;  %v418_v31 = vrot.slane %v412_v11, 4  ;;  %v457_v33 = vmul.f32 %v448_v1, %v217_v3 }
  0x46   : > { %v442_v63 = vadd.f32 %v439_v12, %v337_v19  ;;  %v460_v25 = vadd.f32 %v454_v13, %v361_v21  ;;  %v469_v30 = vperm.slane %v1543_v57, 1  ;;  %v484_v53 = vperm.slane %v1548_v62, 1  ;;  %v182_v21 = vld [vmem:[%s2151_s1 + $0x28] sm:$0x3] }
  0x47   : > { %v686_v34 = vmax.f32 %v683_v17, 0.0  ;;  %v392_v42 = vsel %vm323_vm0, %v390_v28, %v391_v29  ;;  %v424_v43 = vadd.f32 %v418_v31, %v297_v47  ;;  %v427_v44 = vadd.f32 %v418_v31, %v300_v48 }
  0x48   : > { %v463_v45 = vadd.f32 %v457_v33, %v364_v22  ;;  %v400_v50 = vadd.f32 %v392_v42, %v285_v41  ;;  %v475_v51 = vmul.f32 %v469_v30, %v220_v18  ;;  %v505_v54 = vperm.slane %v1557_v5, 1  ;;  %v179_v18 = vld [vmem:[%s2151_s1 + $0x10] sm:$0xe0] }
  0x49   : > { %689 = vst [vmem:[#allocation2] sm:$0x1f] %v686_v34  ;;  %v541_v56 = vperm.slane %v1567_v14, 1  ;;  %v568_v47 = vperm.slane %v1570_v16, 1  ;;  %v604_v48 = vperm.slane %v1576_v24, 1  ;;  %v253_v58 = vperm.slane %v1455_v6, 2 }
  0x4a   : > { %v478_v59 = vadd.f32 %v475_v51, %v400_v50  ;;  %v490_v60 = vmul.f32 %v484_v53, %v223_v27  ;;  %v493_v41 = vmul.f32 %v484_v53, %v226_v35  ;;  %v511_v61 = vmul.f32 %v505_v54, %v229_v36  ;;  %v185_v35 = vld [vmem:[%s2151_s1 + $0x28] sm:$0x7c]  ;;  %v203_v53 = vld [vmem:[%s2151_s1 + $0x58] sm:$0xc0] }
  0x4b   : > { %v514_v0 = vmul.f32 %v505_v54, %v232_v37  ;;  %v547_v1 = vmul.f32 %v541_v56, %v235_v39  ;;  %v574_v2 = vmul.f32 %v568_v47, %v238_v40  ;;  %v577_v3 = vmul.f32 %v568_v47, %v241_v49  ;;  %v206_v56 = vld [vmem:[%s2151_s1 + $0x70] sm:$0x7] }
  0x4c   : > { %v496_v7 = vadd.f32 %v490_v60, %v424_v43  ;;  %v499_v8 = vadd.f32 %v493_v41, %v427_v44  ;;  %v525_v9 = vrot.slane %v511_v61, 4  ;;  %v610_v11 = vmul.f32 %v604_v48, %v244_v55  ;;  %v200_v43 = vld [vmem:[%s2151_s1 + $0x58] sm:$0x3e]  ;;  %v209_v41 = vld [vmem:[%s2151_s1 + $0x70] sm:$0xf8] }
  0x4d   : > { %v526_v12 = vrot.slane %v514_v0, 4  ;;  %v553_v13 = vrot.slane %v547_v1, 4  ;;  %v588_v17 = vrot.slane %v574_v2, 4  ;;  %v589_v6 = vrot.slane %v577_v3, 4 }
  0x4e   : > { %v616_v19 = vrot.slane %v610_v11, 4  ;;  %v1699_v22 = vmul.f32 %v253_v58, %v176_v4  ;;  %v265_v27 = vperm.slane %v1467_v10, 2  ;;  %v280_v28 = vperm.slane %v1478_v15, 2  ;;  %v188_v10 = vld [vmem:[%s2151_s1 + $0x28] sm:$0x80] }
  0x4f   : > { %v527_v29 = vsel %vm323_vm0, %v525_v9, %v526_v12  ;;  %v559_v31 = vadd.f32 %v553_v13, %v460_v25  ;;  %v562_v33 = vadd.f32 %v553_v13, %v463_v45  ;;  %v590_v34 = vsel %vm323_vm0, %v588_v17, %v589_v6  ;;  %v191_v15 = vld [vmem:[%s2151_s1 + $0x40] sm:$0xf]  ;;  %v194_v25 = vld [vmem:[%s2151_s1 + $0x40] sm:$0xf0]  ;;  %v212_v9 = vld [vmem:[%s2151_s1 + $0x88] sm:$0x1f] }
  0x50   : > { %v535_v36 = vadd.f32 %v527_v29, %v442_v63  ;;  %v598_v30 = vadd.f32 %v590_v34, %v478_v59  ;;  %v622_v37 = vadd.f32 %v616_v19, %v496_v7  ;;  %v625_v39 = vadd.f32 %v616_v19, %v499_v8  ;;  %v197_v63 = vld [vmem:[%s2151_s1 + $0x58] sm:$0x1]  ;;  %v215_v17 = vld [vmem:[%s2151_s1 + $0x88] sm:$0xe0] }
  0x51   : > { %v637_v40 = vrot.slane %v559_v31, 5  ;;  %v638_v42 = vrot.slane %v562_v33, 5  ;;  %v271_v44 = vmul.f32 %v265_v27, %v179_v18  ;;  %v274_v45 = vmul.f32 %v265_v27, %v182_v21  ;;  %v218_v21 = vld [vmem:[%s2151_s1 + $0xa0] sm:$0x3]  ;;  %v224_v33 = vld [vmem:[%s2151_s1 + $0xa0] sm:$0x80] }
  0x52   : > { %v653_v49 = vrot.slane %v598_v30, 2  ;;  %v671_v50 = vrot.slane %v622_v37, 7  ;;  %v672_v51 = vrot.slane %v625_v39, 7  ;;  %v286_v54 = vmul.f32 %v280_v28, %v185_v35  ;;  %v227_v30 = vld [vmem:[%s2151_s1 + $0xb8] sm:$0xf] }
  0x53   : > { %v639_v55 = vsel %vm633_vm1, %v637_v40, %v638_v42  ;;  %v292_v47 = vperm.slane %v1491_v20, 2  ;;  %v307_v48 = vperm.slane %v1498_v23, 2  ;;  %v344_v58 = vperm.slane %v1505_v26, 2  ;;  %v247_v20 = vld [vmem:[%s2151_s1 + $0xf8] sm:$0x1f] }
  0x54   : > { %v647_v59 = vadd.f32 %v639_v55, %v535_v36  ;;  %v673_v60 = vsel %vm667_vm2, %v671_v50, %v672_v51  ;;  %v371_v61 = vperm.slane %v1512_v32, 2  ;;  %v407_v0 = vperm.slane %v1519_v38, 2  ;;  %v233_v37 = vld [vmem:[%s2151_s1 + $0xd0] sm:$0x1]  ;;  %v236_v42 = vld [vmem:[%s2151_s1 + $0xd0] sm:$0x3e] }
  0x55   : > { %v298_v1 = vmul.f32 %v292_v47, %v188_v10  ;;  %v301_v2 = vmul.f32 %v292_v47, %v191_v15  ;;  %v313_v3 = vmul.f32 %v307_v48, %v194_v25  ;;  %v316_v4 = vmul.f32 %v307_v48, %v197_v63  ;;  %v239_v63 = vld [vmem:[%s2151_s1 + $0xd0] sm:$0xc0] }
  0x56   : > { %v659_v23 = vadd.f32 %v653_v49, %v647_v59  ;;  %v350_v26 = vmul.f32 %v344_v58, %v200_v43  ;;  %v377_v7 = vmul.f32 %v371_v61, %v203_v53  ;;  %v380_v8 = vmul.f32 %v371_v61, %v206_v56 }
  0x57   : > { %v330_v11 = vrot.slane %v313_v3, 4  ;;  %v331_v32 = vrot.slane %v316_v4, 4  ;;  %v413_v12 = vmul.f32 %v407_v0, %v209_v41  ;;  %v434_v38 = vperm.slane %v1532_v46, 2  ;;  %v221_v46 = vld [vmem:[%s2151_s1 + $0xa0] sm:$0x7c] }
  0x58   : > { %v681_v13 = vadd.f32 %v673_v60, %v659_v23  ;;  %v356_v6 = vrot.slane %v350_v26, 4  ;;  %v393_v18 = vrot.slane %v377_v7, 4  ;;  %v394_v19 = vrot.slane %v380_v8, 4 }
  0x59   : > { %v332_v27 = vsel %vm323_vm0, %v330_v11, %v331_v32  ;;  %v419_v28 = vrot.slane %v413_v12, 4  ;;  %v449_v29 = vperm.slane %v1538_v52, 2  ;;  %v440_v36 = vmul.f32 %v434_v38, %v212_v9  ;;  %v230_v52 = vld [vmem:[%s2151_s1 + $0xb8] sm:$0xf0] }
  0x5a   : > { %v684_v31 = vadd.f32 %v681_v13, %v247_v20  ;;  %v362_v34 = vadd.f32 %v356_v6, %v271_v44  ;;  %v365_v35 = vadd.f32 %v356_v6, %v274_v45  ;;  %v338_v39 = vadd.f32 %v332_v27, %v1699_v22  ;;  %v242_v22 = vld [vmem:[%s2151_s1 + $0xe8] sm:$0x7] }
  0x5b   : > { %v395_v10 = vsel %vm323_vm0, %v393_v18, %v394_v19  ;;  %v425_v15 = vadd.f32 %v419_v28, %v298_v1  ;;  %v455_v25 = vmul.f32 %v449_v29, %v215_v17  ;;  %v428_v44 = vadd.f32 %v419_v28, %v301_v2 }
  0x5c   : > { %v687_v40 = vmax.f32 %v684_v31, 0.0  ;;  %v401_v43 = vadd.f32 %v395_v10, %v286_v54  ;;  %v458_v45 = vmul.f32 %v449_v29, %v218_v21  ;;  %v470_v50 = vperm.slane %v1543_v57, 2  ;;  %v245_v57 = vld [vmem:[%s2151_s1 + $0xe8] sm:$0xf8] }
  0x5d   : > { %v461_v49 = vadd.f32 %v455_v25, %v362_v34  ;;  %v485_v51 = vperm.slane %v1548_v62, 2  ;;  %v506_v53 = vperm.slane %v1557_v5, 2  ;;  %v542_v56 = vperm.slane %v1567_v14, 2  ;;  %v1818_v25 = vld [vmem:[%s2151_s1 + $0xf0] sm:$0xe0] }
  0x5e   : > { %690 = vst [vmem:[#allocation2 + $0x8] sm:$0x1f] %v687_v40  ;;  %v464_v55 = vadd.f32 %v458_v45, %v365_v35  ;;  %v569_v47 = vperm.slane %v1570_v16, 2  ;;  %v605_v54 = vperm.slane %v1576_v24, 2  ;;  %v476_v48 = vmul.f32 %v470_v50, %v221_v46  ;;  %v248_v46 = vld [vmem:[%s2151_s1 + $0x100] sm:$0x1f] }
  0x5f   : > { %v491_v58 = vmul.f32 %v485_v51, %v224_v33  ;;  %v494_v59 = vmul.f32 %v485_v51, %v227_v30  ;;  %v512_v60 = vmul.f32 %v506_v53, %v230_v52  ;;  %v515_v41 = vmul.f32 %v506_v53, %v233_v37  ;;  %v719_v30 = vld [vmem:[%s2151_s1 + $0x150] sm:$0x7]  ;;  %v717_v52 = vld [vmem:[%s2151_s1 + $0x140] sm:$0xc0]  ;;  %v720_v37 = vld [vmem:[%s2151_s1 + $0x158] sm:$0x7] }
  0x60   : > { %v548_v62 = vmul.f32 %v542_v56, %v236_v42  ;;  %v575_v61 = vmul.f32 %v569_v47, %v239_v63  ;;  %v578_v5 = vmul.f32 %v569_v47, %v242_v22  ;;  %v443_v0 = vadd.f32 %v440_v36, %v338_v39  ;;  %v716_v36 = vld [vmem:[%s2151_s1 + $0x138] sm:$0xc0]  ;;  %v1811_v39 = vld [vmem:[%s2151_s1 + $0x148] sm:$0xc0]  ;;  %v1823_v40 = vld [vmem:[%s2151_s1 + $0x108] sm:$0x3] }
  0x61   : > { %v479_v1 = vadd.f32 %v476_v48, %v401_v43  ;;  %v528_v2 = vrot.slane %v512_v60, 4  ;;  %v529_v14 = vrot.slane %v515_v41, 4  ;;  %v497_v24 = vadd.f32 %v491_v58, %v425_v15  ;;  %v1828_v42 = vld [vmem:[%s2151_s1 + $0x108] sm:$0x7c]  ;;  %v1840_v45 = vld [vmem:[%s2151_s1 + $0x120] sm:$0xf] }
  0x62   : > { %v554_v3 = vrot.slane %v548_v62, 4  ;;  %v591_v16 = vrot.slane %v575_v61, 4  ;;  %v592_v4 = vrot.slane %v578_v5, 4  ;;  %v500_v20 = vadd.f32 %v494_v59, %v428_v44  ;;  %v1835_v44 = vld [vmem:[%s2151_s1 + $0x108] sm:$0x80] }
  0x63   : > { %v611_v23 = vmul.f32 %v605_v54, %v245_v57  ;;  %v530_v26 = vsel %vm323_vm0, %v528_v2, %v529_v14  ;;  %v876_v10 = vrot.slane %v716_v36, 1  ;;  %v1813_v15 = vrot.slane %v719_v30, 1  ;;  %v1845_v22 = vld [vmem:[%s2151_s1 + $0xf8] sm:$0xe0]  ;;  %v1855_v53 = vld [vmem:[%s2151_s1 + $0x120] sm:$0xf0] }
  0x64   : > { %v560_v7 = vadd.f32 %v554_v3, %v461_v49  ;;  %v563_v8 = vadd.f32 %v554_v3, %v464_v55  ;;  %v593_v9 = vsel %vm323_vm0, %v591_v16, %v592_v4  ;;  %v536_v11 = vadd.f32 %v530_v26, %v443_v0  ;;  %v1860_v55 = vld [vmem:[%s2151_s1 + $0x138] sm:$0x1]  ;;  %v1865_v56 = vld [vmem:[%s2151_s1 + $0x110] sm:$0x3]  ;;  %v1870_v47 = vld [vmem:[%s2151_s1 + $0x110] sm:$0x7c] }
  0x65   : > { %v599_v32 = vadd.f32 %v593_v9, %v479_v1  ;;  %v617_v12 = vrot.slane %v611_v23, 4  ;;  %v879_v63 = vrot.slane %v717_v52, 1  ;;  %v1830_v43 = vrot.slane %v720_v37, 1  ;;  %v1877_v48 = vld [vmem:[%s2151_s1 + $0x138] sm:$0x3e] }
  0x66   : > { %v640_v38 = vrot.slane %v560_v7, 5  ;;  %v641_v13 = vrot.slane %v563_v8, 5  ;;  %vm769_vm4 = vcmask 1045504   ;;  %v882_v49 = vrot.slane %v1811_v39, 1  ;;  %v1904_v4 = vld [vmem:[%s2151_s1 + $0x110] sm:$0x80] }
  0x67   : > { %v623_v17 = vadd.f32 %v617_v12, %v497_v24  ;;  %v626_v6 = vadd.f32 %v617_v12, %v500_v20  ;;  %v654_v18 = vrot.slane %v599_v32, 2  ;;  %v1883_v60 = vsel %vm875_vm3, %v876_v10, %v1813_v15  ;;  %v1912_v26 = vld [vmem:[%s2151_s1 + $0x128] sm:$0xf]  ;;  %v1938_v36 = vld [vmem:[%s2151_s1 + $0x140] sm:$0x3e] }
  0x68   : > { %v642_v19 = vsel %vm633_vm1, %v640_v38, %v641_v13  ;;  %v1893_v0 = vsel %vm875_vm3, %v879_v63, %v1830_v43  ;;  %vm1201_vm5 = vcmask 1044480  }
  0x69   : > { %v648_v21 = vadd.f32 %v642_v19, %v536_v11  ;;  %v674_v27 = vrot.slane %v623_v17, 7  ;;  %v675_v28 = vrot.slane %v626_v6, 7  ;;  %v1923_v17 = vld [vmem:[%s2151_s1 + $0x128] sm:$0xf0] }
  0x6b   : > { %v660_v29 = vadd.f32 %v654_v18, %v648_v21  ;;  %v676_v31 = vsel %vm667_vm2, %v674_v27, %v675_v28  ;;  %v1929_v21 = vld [vmem:[%s2151_s1 + $0x140] sm:$0x1] }
  0x6d   : > { %v682_v33 = vadd.f32 %v676_v31, %v660_v29 }
  0x6f   : > { %v685_v34 = vadd.f32 %v682_v33, %v248_v46 }
  0x71   : > { %v688_v35 = vmax.f32 %v685_v34, 0.0 }
  0x73   : > { %691 = vst [vmem:[#allocation2 + $0x10] sm:$0x1f] %v688_v35 }
  0x7a   : > { %v1848_v50 = vld [vmem:[#allocation2] ss:$8 sm:$0x7]  ;;  %v1850_v51 = vld [vmem:[#allocation2 + $0x1] ss:$8 sm:$0x7] }
  0x7b   : > { %v1872_v54 = vld [vmem:[#allocation2 + $0x2] ss:$8 sm:$0x7]  ;;  %v724_v58 = vperm.slane %v1848_v50, 0  ;;  %v739_v59 = vperm.slane %v1850_v51, 0  ;;  %v725_v57 = vperm.slane %v1848_v50, 1 }
  0x7c   : > { %v751_v41 = vperm.slane %v1872_v54, 0  ;;  %v1887_v62 = vld [vmem:[#allocation2 + $0x3] ss:$8 sm:$0x7]  ;;  %v740_v61 = vperm.slane %v1850_v51, 1  ;;  %v752_v5 = vperm.slane %v1872_v54, 1 }
  0x7d   : > { %v730_v1 = vmul.f32 %v724_v58, %v1818_v25  ;;  %v733_v2 = vmul.f32 %v724_v58, %v1823_v40  ;;  %v745_v14 = vmul.f32 %v739_v59, %v1828_v42  ;;  %v794_v3 = vperm.slane %v1887_v62, 0  ;;  %v1899_v16 = vld [vmem:[#allocation2 + $0x4] ss:$8 sm:$0x7] }
  0x7e   : > { %v757_v24 = vmul.f32 %v751_v41, %v1835_v44  ;;  %v760_v20 = vmul.f32 %v751_v41, %v1840_v45  ;;  %v830_v23 = vperm.slane %v1899_v16, 0  ;;  %v731_v7 = vmul.f32 %v725_v57, %v1845_v22 }
  0x7f   : > { %v800_v8 = vmul.f32 %v794_v3, %v1855_v53  ;;  %v803_v9 = vmul.f32 %v794_v3, %v1860_v55  ;;  %v734_v11 = vmul.f32 %v725_v57, %v1865_v56  ;;  %v746_v32 = vmul.f32 %v740_v61, %v1870_v47 }
  0x80   : > { %v770_v12 = vrot.slane %v757_v24, 2  ;;  %v771_v38 = vrot.slane %v760_v20, 2  ;;  %v836_v13 = vmul.f32 %v830_v23, %v1877_v48  ;;  %v758_v6 = vmul.f32 %v752_v5, %v1904_v4  ;;  %v1953_v24 = vld [vmem:[%s2151_s1 + $0x118] sm:$0x3]  ;;  %v1958_v20 = vld [vmem:[%s2151_s1 + $0x118] sm:$0x7c] }
  0x81   : > { %v812_v18 = vrot.slane %v800_v8, 2  ;;  %v813_v19 = vrot.slane %v803_v9, 2  ;;  %v761_v27 = vmul.f32 %v752_v5, %v1912_v26  ;;  %v795_v28 = vperm.slane %v1887_v62, 1  ;;  %v1947_v5 = vld [vmem:[%s2151_s1 + $0x100] sm:$0xe0] }
  0x82   : > { %v772_v29 = vsel %vm769_vm4, %v770_v12, %v771_v38  ;;  %v788_v31 = vadd.f32 %v771_v38, %v733_v2  ;;  %v842_v46 = vrot.slane %v836_v13, 4  ;;  %v773_v33 = vrot.slane %v758_v6, 2  ;;  %v1963_v23 = vld [vmem:[%s2151_s1 + $0x118] sm:$0x80] }
  0x83   : > { %v785_v34 = vadd.f32 %v772_v29, %v730_v1  ;;  %v814_v35 = vsel %vm769_vm4, %v812_v18, %v813_v19  ;;  %v774_v30 = vrot.slane %v761_v27, 2  ;;  %v801_v52 = vmul.f32 %v795_v28, %v1923_v17  ;;  %v1973_v18 = vld [vmem:[%s2151_s1 + $0x130] sm:$0xf] }
  0x84   : > { %v824_v37 = vadd.f32 %v814_v35, %v745_v14  ;;  %v851_v10 = vadd.f32 %v842_v46, %v788_v31  ;;  %v804_v63 = vmul.f32 %v795_v28, %v1929_v21  ;;  %v831_v58 = vperm.slane %v1899_v16, 1 }
  0x85   : > { %v848_v59 = vadd.f32 %v842_v46, %v785_v34  ;;  %v775_v57 = vsel %vm769_vm4, %v773_v33, %v774_v30  ;;  %v789_v41 = vadd.f32 %v774_v30, %v734_v11  ;;  %v815_v61 = vrot.slane %v801_v52, 2 }
  0x86   : > { %v857_v1 = vrot.slane %v824_v37, 5  ;;  %v786_v2 = vadd.f32 %v775_v57, %v731_v7  ;;  %v816_v3 = vrot.slane %v804_v63, 2  ;;  %v837_v14 = vmul.f32 %v831_v58, %v1938_v36 }
  0x87   : > { %v726_v7 = vperm.slane %v1848_v50, 2  ;;  %v741_v8 = vperm.slane %v1850_v51, 2  ;;  %v753_v9 = vperm.slane %v1872_v54, 2  ;;  %v796_v11 = vperm.slane %v1887_v62, 2  ;;  %v1978_v50 = vld [vmem:[%s2151_s1 + $0x130] sm:$0xf0] }
  0x88   : > { %v863_v12 = vadd.f32 %v857_v1, %v848_v59  ;;  %v866_v38 = vadd.f32 %v857_v1, %v851_v10  ;;  %v817_v13 = vsel %vm769_vm4, %v815_v61, %v816_v3  ;;  %v843_v6 = vrot.slane %v837_v14, 4  ;;  %v1983_v54 = vld [vmem:[%s2151_s1 + $0x148] sm:$0x1]  ;;  %v1998_v59 = vld [vmem:[%s2151_s1 + $0x148] sm:$0x3e] }
  0x89   : > { %v825_v51 = vadd.f32 %v817_v13, %v746_v32  ;;  %v732_v62 = vmul.f32 %v726_v7, %v1947_v5  ;;  %v735_v19 = vmul.f32 %v726_v7, %v1953_v24  ;;  %v747_v27 = vmul.f32 %v741_v8, %v1958_v20 }
  0x8a   : > { %v891_v28 = vadd.f32 %v1883_v60, %v863_v12  ;;  %v894_v29 = vadd.f32 %v1813_v15, %v866_v38  ;;  %v849_v31 = vadd.f32 %v843_v6, %v786_v2  ;;  %v852_v46 = vadd.f32 %v843_v6, %v789_v41  ;;  %v721_v2 = vld [vmem:[%s2151_s1 + $0x160] sm:$0x7] }
  0x8b   : > { %v858_v33 = vrot.slane %v825_v51, 5  ;;  %v759_v32 = vmul.f32 %v753_v9, %v1963_v23  ;;  %v762_v34 = vmul.f32 %v753_v9, %v1973_v18  ;;  %v802_v35 = vmul.f32 %v796_v11, %v1978_v50 }
  0x8c   : > { %v897_v30 = vmax.f32 %v891_v28, 0.0  ;;  %v900_v52 = vmax.f32 %v894_v29, 0.0  ;;  %v805_v37 = vmul.f32 %v796_v11, %v1983_v54  ;;  %v832_v10 = vperm.slane %v1899_v16, 2 }
  0x8d   : > { %v864_v63 = vadd.f32 %v858_v33, %v849_v31  ;;  %v867_v58 = vadd.f32 %v858_v33, %v852_v46  ;;  %v776_v57 = vrot.slane %v759_v32, 2  ;;  %v777_v41 = vrot.slane %v762_v34, 2 }
  0x8e   : > { %v909_v61 = vrot.slane %v897_v30, 5  ;;  %v910_v1 = vrot.slane %v900_v52, 5  ;;  %v818_v3 = vrot.slane %v802_v35, 2  ;;  %v819_v14 = vrot.slane %v805_v37, 2 }
  0x8f   : > { %v892_v7 = vadd.f32 %v1893_v0, %v864_v63  ;;  %v895_v16 = vadd.f32 %v1830_v43, %v867_v58  ;;  %v778_v8 = vsel %vm769_vm4, %v776_v57, %v777_v41  ;;  %v790_v9 = vadd.f32 %v777_v41, %v735_v19 }
  0x90   : > { %v911_v11 = vsel %vm633_vm1, %v909_v61, %v910_v1  ;;  %v787_v12 = vadd.f32 %v778_v8, %v732_v62  ;;  %v820_v38 = vsel %vm769_vm4, %v818_v3, %v819_v14  ;;  %v838_v13 = vmul.f32 %v832_v10, %v1998_v59 }
  0x91   : > { %921 = vst [vmem:[#allocation2] sm:$0x1f] %v911_v11  ;;  %v898_v6 = vmax.f32 %v892_v7, 0.0  ;;  %v901_v51 = vmax.f32 %v895_v16, 0.0  ;;  %v826_v28 = vadd.f32 %v820_v38, %v747_v27  ;;  %v2009_v29 = vrot.slane %v721_v2, 1 }
  0x92   : > { %v844_v31 = vrot.slane %v838_v13, 4 }
  0x93   : > { %v912_v46 = vrot.slane %v898_v6, 5  ;;  %v913_v33 = vrot.slane %v901_v51, 5  ;;  %v859_v32 = vrot.slane %v826_v28, 5  ;;  %v2016_v62 = vsel %vm875_vm3, %v882_v49, %v2009_v29 }
  0x94   : > { %v850_v34 = vadd.f32 %v844_v31, %v787_v12  ;;  %v853_v35 = vadd.f32 %v844_v31, %v790_v9 }
  0x95   : > { %v914_v19 = vsel %vm633_vm1, %v912_v46, %v913_v33 }
  0x96   : > { %922 = vst [vmem:[#allocation2 + $0x8] sm:$0x1f] %v914_v19  ;;  %v865_v30 = vadd.f32 %v859_v32, %v850_v34  ;;  %v868_v52 = vadd.f32 %v859_v32, %v853_v35 }
  0x98   : > { %v893_v27 = vadd.f32 %v2016_v62, %v865_v30  ;;  %v896_v37 = vadd.f32 %v2009_v29, %v868_v52 }
  0x9a   : > { %v899_v10 = vmax.f32 %v893_v27, 0.0  ;;  %v902_v63 = vmax.f32 %v896_v37, 0.0 }
  0x9c   : > { %v915_v58 = vrot.slane %v899_v10, 5  ;;  %v916_v57 = vrot.slane %v902_v63, 5 }
  0x9e   : > { %v917_v41 = vsel %vm633_vm1, %v915_v58, %v916_v57 }
  0x9f   : > { %923 = vst [vmem:[#allocation2 + $0x10] sm:$0x1f] %v917_v41 }
  0xa6   : > { %v2021_v61 = vld [vmem:[#allocation2] ss:$8 sm:$0x7]  ;;  %v2023_v39 = vld [vmem:[#allocation2 + $0x1] ss:$8 sm:$0x7] }
  0xa7   : > { %v2025_v49 = vld [vmem:[#allocation2 + $0x2] ss:$8 sm:$0x7]  ;;  %v990_v2 = vld [vmem:[#allocation2 + $0x3] ss:$8 sm:$0x7] }
  0xa8   : > { %v953_v1 = vperm.slane %v2025_v49, 2  ;;  %v928_v3 = vperm.slane %v2021_v61, 2  ;;  %v942_v14 = vperm.slane %v2023_v39, 2  ;;  %v992_v7 = vperm.slane %v990_v2, 0 }
  0xa9   : > { %v926_v16 = vperm.slane %v2021_v61, 0  ;;  %v993_v11 = vperm.slane %v990_v2, 1  ;;  %v994_v12 = vperm.slane %v990_v2, 2  ;;  %v1025_v6 = vld [vmem:[#allocation2 + $0x4] ss:$8 sm:$0x7] }
  0xaa   : > { %v959_v8 = vmul.f32 %v953_v1, %v1963_v23  ;;  %v962_v9 = vmul.f32 %v953_v1, %v1973_v18  ;;  %v998_v38 = vmul.f32 %v992_v7, %v1855_v53  ;;  %v1001_v13 = vmul.f32 %v992_v7, %v1860_v55 }
  0xab   : > { %v940_v51 = vperm.slane %v2023_v39, 0  ;;  %v951_v28 = vperm.slane %v2025_v49, 0  ;;  %v999_v33 = vmul.f32 %v993_v11, %v1923_v17  ;;  %v1000_v32 = vmul.f32 %v994_v12, %v1978_v50 }
  0xac   : > { %v975_v31 = vrot.slane %v959_v8, 2  ;;  %v976_v46 = vrot.slane %v962_v9, 2  ;;  %v934_v23 = vmul.f32 %v928_v3, %v1947_v5  ;;  %v937_v18 = vmul.f32 %v928_v3, %v1953_v24 }
  0xad   : > { %v1002_v34 = vmul.f32 %v993_v11, %v1929_v21  ;;  %v1003_v53 = vmul.f32 %v994_v12, %v1983_v54  ;;  %v948_v55 = vmul.f32 %v942_v14, %v1958_v20  ;;  %v1016_v19 = vrot.slane %v1000_v32, 2 }
  0xae   : > { %v977_v35 = vsel %vm769_vm4, %v975_v31, %v976_v46  ;;  %v1027_v30 = vperm.slane %v1025_v6, 0  ;;  %v1010_v52 = vrot.slane %v998_v38, 2  ;;  %v1011_v27 = vrot.slane %v1001_v13, 2 }
  0xaf   : > { %v1017_v37 = vrot.slane %v1003_v53, 2  ;;  %v1029_v17 = vperm.slane %v1025_v6, 2  ;;  %v986_v10 = vadd.f32 %v977_v35, %v934_v23  ;;  %v989_v50 = vadd.f32 %v976_v46, %v937_v18 }
  0xb0   : > { %v1013_v63 = vrot.slane %v999_v33, 2  ;;  %v1028_v5 = vperm.slane %v1025_v6, 1  ;;  %v1014_v58 = vrot.slane %v1002_v34, 2  ;;  %v957_v54 = vmul.f32 %v951_v28, %v1835_v44 }
  0xb1   : > { %v1018_v24 = vsel %vm769_vm4, %v1016_v19, %v1017_v37  ;;  %v1035_v21 = vmul.f32 %v1029_v17, %v1998_v59  ;;  %v1033_v57 = vmul.f32 %v1027_v30, %v1877_v48  ;;  %v946_v41 = vmul.f32 %v940_v51, %v1828_v42 }
  0xb2   : > { %v1024_v20 = vadd.f32 %v1018_v24, %v948_v55  ;;  %v960_v1 = vmul.f32 %v951_v28, %v1840_v45  ;;  %v935_v3 = vmul.f32 %v926_v16, %v1823_v40  ;;  %v969_v14 = vrot.slane %v957_v54, 2 }
  0xb3   : > { %v1041_v2 = vrot.slane %v1035_v21, 4  ;;  %v1012_v7 = vsel %vm769_vm4, %v1010_v52, %v1011_v27  ;;  %v941_v59 = vperm.slane %v2023_v39, 1  ;;  %v1034_v44 = vmul.f32 %v1028_v5, %v1938_v36 }
  0xb4   : > { %v1056_v8 = vrot.slane %v1024_v20, 5  ;;  %v970_v9 = vrot.slane %v960_v1, 2  ;;  %v1022_v11 = vadd.f32 %v1012_v7, %v946_v41  ;;  %v932_v48 = vmul.f32 %v926_v16, %v1818_v25 }
  0xb5   : > { %v1047_v12 = vadd.f32 %v1041_v2, %v986_v10  ;;  %v1050_v38 = vadd.f32 %v1041_v2, %v989_v50  ;;  %v1039_v42 = vrot.slane %v1033_v57, 4  ;;  %v952_v31 = vperm.slane %v2025_v49, 1 }
  0xb6   : > { %v971_v45 = vsel %vm769_vm4, %v969_v14, %v970_v9  ;;  %v987_v13 = vadd.f32 %v970_v9, %v935_v3  ;;  %v1054_v6 = vrot.slane %v1022_v11, 5  ;;  %v927_v33 = vperm.slane %v2021_v61, 1 }
  0xb7   : > { %v1062_v40 = vadd.f32 %v1056_v8, %v1047_v12  ;;  %v1065_v51 = vadd.f32 %v1056_v8, %v1050_v38  ;;  %v984_v28 = vadd.f32 %v971_v45, %v932_v48  ;;  %v947_v39 = vmul.f32 %v941_v59, %v1870_v47 }
  0xb8   : > { %v1048_v46 = vadd.f32 %v1039_v42, %v987_v13  ;;  %v1015_v36 = vsel %vm769_vm4, %v1013_v63, %v1014_v58  ;;  %v958_v23 = vmul.f32 %v952_v31, %v1904_v4  ;;  %v961_v34 = vmul.f32 %v952_v31, %v1912_v26  ;;  %v1136_v31 = vld [vmem:[%s2151_s1 + $0x158] sm:$0xc0] }
  0xb9   : > { %v1068_v32 = vadd.f32 %v1062_v40, %v2016_v62  ;;  %v1071_v25 = vadd.f32 %v1065_v51, %v2009_v29  ;;  %v1045_v16 = vadd.f32 %v1039_v42, %v984_v28  ;;  %v1023_v53 = vadd.f32 %v1015_v36, %v947_v39  ;;  %v1135_v28 = vld [vmem:[%s2151_s1 + $0x150] sm:$0xc0] }
  0xba   : > { %v1063_v18 = vadd.f32 %v1054_v6, %v1048_v46  ;;  %v972_v19 = vrot.slane %v958_v23, 2  ;;  %v936_v47 = vmul.f32 %v927_v33, %v1865_v56  ;;  %v973_v30 = vrot.slane %v961_v34, 2  ;;  %v1137_v46 = vld [vmem:[%s2151_s1 + $0x160] sm:$0xc0] }
  0xbb   : > { %v1084_v55 = vrot.slane %v1068_v32, 5  ;;  %v1085_v49 = vrot.slane %v1071_v25, 5  ;;  %v1060_v35 = vadd.f32 %v1054_v6, %v1045_v16  ;;  %v1040_v52 = vrot.slane %v1034_v44, 4  ;;  %v1139_v32 = vld [vmem:[%s2151_s1 + $0x170] sm:$0x1] }
  0xbc   : > { %v1069_v61 = vadd.f32 %v1063_v18, %v1813_v15  ;;  %v933_v4 = vmul.f32 %v927_v33, %v1845_v22  ;;  %v974_v26 = vsel %vm769_vm4, %v972_v19, %v973_v30  ;;  %v988_v37 = vadd.f32 %v973_v30, %v936_v47  ;;  %v1138_v33 = vld [vmem:[%s2151_s1 + $0x168] sm:$0x1]  ;;  %v1140_v25 = vld [vmem:[%s2151_s1 + $0x178] sm:$0x1]  ;;  %v1141_v47 = vld [vmem:[%s2151_s1 + $0x168] sm:$0xe] }
  0xbd   : > { %v1086_v62 = vsel %vm633_vm1, %v1084_v55, %v1085_v49  ;;  %v1066_v29 = vadd.f32 %v1060_v35, %v1883_v60  ;;  %v1055_v17 = vrot.slane %v1023_v53, 5  ;;  %v1132_v53 = vld [vmem:[%s2151_s1 + $0x150] sm:$0x38]  ;;  %v1133_v55 = vld [vmem:[%s2151_s1 + $0x158] sm:$0x38] }
  0xbe   : > { %1092 = vst [vmem:[#allocation2 + $0x10] sm:$0x1f] %v1086_v62  ;;  %v1079_v27 = vrot.slane %v1069_v61, 5  ;;  %v985_v50 = vadd.f32 %v974_v26, %v933_v4  ;;  %v1049_v63 = vadd.f32 %v1040_v52, %v988_v37  ;;  %v1142_v30 = vld [vmem:[%s2151_s1 + $0x170] sm:$0xe] }
  0xbf   : > { %v1078_v10 = vrot.slane %v1066_v29, 5  ;;  %v1144_v26 = vld [vmem:[%s2151_s1 + $0x168] sm:$0x70] }
  0xc0   : > { %v1046_v56 = vadd.f32 %v1040_v52, %v985_v50  ;;  %v1064_v5 = vadd.f32 %v1055_v17, %v1049_v63  ;;  %v1143_v52 = vld [vmem:[%s2151_s1 + $0x178] sm:$0xe]  ;;  %v1134_v63 = vld [vmem:[%s2151_s1 + $0x160] sm:$0x38] }
  0xc1   : > { %v1080_v15 = vsel %vm633_vm1, %v1078_v10, %v1079_v27 }
  0xc2   : > { %1090 = vst [vmem:[#allocation2] sm:$0x1f] %v1080_v15  ;;  %v1061_v58 = vadd.f32 %v1055_v17, %v1046_v56  ;;  %v1070_v24 = vadd.f32 %v1064_v5, %v1830_v43 }
  0xc4   : > { %v1067_v60 = vadd.f32 %v1061_v58, %v1893_v0  ;;  %v1082_v54 = vrot.slane %v1070_v24, 5  ;;  %v1145_v24 = vld [vmem:[%s2151_s1 + $0x170] sm:$0x70] }
  0xc5   : > { %v1098_v22 = vld [vmem:[#allocation2 + $0x10] sm:$0xe] }
  0xc6   : > { %v1113_v21 = vld [vmem:[#allocation2 + $0x10] sm:$0x1c]  ;;  %v1104_v20 = vrot.slane %v1098_v22, 1  ;;  %v1081_v57 = vrot.slane %v1067_v60, 5 }
  0xc7   : > { %v1095_v41 = vld [vmem:[#allocation2 + $0x10] sm:$0x7]  ;;  %v1119_v2 = vrot.slane %v1113_v21, 2 }
  0xc8   : > { %v1110_v1 = vmax.f32 %v1095_v41, %v1104_v20  ;;  %v1083_v3 = vsel %vm633_vm1, %v1081_v57, %v1082_v54  ;;  %v1146_v20 = vld [vmem:[%s2151_s1 + $0x178] sm:$0x70] }
  0xc9   : > { %v1096_v14 = vld [vmem:[#allocation2] sm:$0xe]  ;;  %1091 = vst [vmem:[#allocation2 + $0x8] sm:$0x1f] %v1083_v3 }
  0xca   : > { %v1111_v7 = vld [vmem:[#allocation2] sm:$0x1c]  ;;  %v1102_v8 = vrot.slane %v1096_v14, 1  ;;  %v1125_v9 = vmax.f32 %v1110_v1, %v1119_v2  ;;  %v1220_v2 = vrot.slane %v1144_v26, 1 }
  0xcb   : > { %v1093_v11 = vld [vmem:[#allocation2] sm:$0x7]  ;;  %v1117_v43 = vrot.slane %v1111_v7, 2 }
  0xcc   : > { %v1108_v59 = vmax.f32 %v1093_v11, %v1102_v8  ;;  %v1128_v44 = vmax.f32 %v1125_v9, 0.0 }
  0xce   : > { %v1123_v0 = vmax.f32 %v1108_v59, %v1117_v43  ;;  %1131 = vst [vmem:[#allocation2 + $0x10] sm:$0x7] %v1128_v44  ;;  %v1221_v43 = vrot.slane %v1145_v24, 1 }
  0xd0   : > { %v1126_v12 = vmax.f32 %v1123_v0, 0.0  ;;  %v1097_v38 = vld [vmem:[#allocation2 + $0x8] sm:$0xe] }
  0xd1   : > { %v1112_v48 = vld [vmem:[#allocation2 + $0x8] sm:$0x1c]  ;;  %v1103_v42 = vrot.slane %v1097_v38, 1  ;;  %v1222_v38 = vrot.slane %v1146_v20, 1 }
  0xd2   : > { %1129 = vst [vmem:[#allocation2] sm:$0x7] %v1126_v12  ;;  %v1094_v45 = vld [vmem:[#allocation2 + $0x8] sm:$0x7]  ;;  %v1118_v6 = vrot.slane %v1112_v48, 2 }
  0xd3   : > { %v1109_v13 = vmax.f32 %v1094_v45, %v1103_v42 }
  0xd5   : > { %v1124_v40 = vmax.f32 %v1109_v13, %v1118_v6 }
  0xd7   : > { %v1127_v51 = vmax.f32 %v1124_v40, 0.0 }
  0xd9   : > { %1130 = vst [vmem:[#allocation2 + $0x8] sm:$0x7] %v1127_v51 }
  0xe0   : > { %v1147_v39 = vld [vmem:[#allocation2] ss:$8 sm:$0x7]  ;;  %v1158_v36 = vld [vmem:[#allocation2 + $0x1] ss:$8 sm:$0x7] }
  0xe1   : > { %v1160_v16 = vperm.slane %v1158_v36, 0  ;;  %v1161_v23 = vperm.slane %v1158_v36, 1  ;;  %v1162_v18 = vperm.slane %v1158_v36, 2  ;;  %v1172_v34 = vld [vmem:[#allocation2 + $0x2] ss:$8 sm:$0x7] }
  0xe2   : > { %v1149_v49 = vperm.slane %v1147_v39, 0  ;;  %v1150_v35 = vperm.slane %v1147_v39, 1  ;;  %v1151_v19 = vperm.slane %v1147_v39, 2  ;;  %v1174_v17 = vperm.slane %v1172_v34, 0 }
  0xe3   : > { %v1166_v61 = vmul.f32 %v1160_v16, %v1135_v28  ;;  %v1167_v62 = vmul.f32 %v1161_v23, %v1136_v31  ;;  %v1168_v29 = vmul.f32 %v1162_v18, %v1137_v46  ;;  %v1169_v4 = vmul.f32 %v1160_v16, %v1138_v33  ;;  %v1343_v36 = vld [vmem:[%s2151_s1 + $0x16f] ss:$8 sm:$0x7] }
  0xe4   : > { %v1170_v27 = vmul.f32 %v1161_v23, %v1139_v32  ;;  %v1171_v37 = vmul.f32 %v1162_v18, %v1140_v25  ;;  %v1175_v10 = vperm.slane %v1172_v34, 1  ;;  %v1176_v50 = vperm.slane %v1172_v34, 2  ;;  %v1345_v32 = vld [vmem:[%s2151_s1 + $0x181] ss:$8 sm:$0x7] }
  0xe5   : > { %v1202_v15 = vrot.slane %v1166_v61, 3  ;;  %v1203_v56 = vrot.slane %v1169_v4, 3  ;;  %v1205_v5 = vrot.slane %v1167_v62, 3  ;;  %v1180_v60 = vmul.f32 %v1174_v17, %v1141_v47  ;;  %v1344_v25 = vld [vmem:[%s2151_s1 + $0x180] ss:$8 sm:$0x7] }
  0xe6   : > { %v1206_v58 = vrot.slane %v1170_v27, 3  ;;  %v1181_v22 = vmul.f32 %v1175_v10, %v1142_v30  ;;  %v1182_v21 = vmul.f32 %v1176_v50, %v1143_v52  ;;  %v1208_v54 = vrot.slane %v1168_v29, 3 }
  0xe7   : > { %v1155_v57 = vmul.f32 %v1149_v49, %v1132_v53  ;;  %v1156_v41 = vmul.f32 %v1150_v35, %v1133_v55  ;;  %v1209_v1 = vrot.slane %v1171_v37, 3  ;;  %v1157_v3 = vmul.f32 %v1151_v19, %v1134_v63  ;;  %v1346_v19 = vld [vmem:[%s2151_s1 + $0x182] ss:$8 sm:$0x7] }
  0xe8   : > { %v1186_v14 = vrot.slane %v1180_v60, 6  ;;  %v1187_v7 = vrot.slane %v1181_v22, 6  ;;  %v1188_v8 = vrot.slane %v1182_v21, 6  ;;  %v1204_v9 = vsel %vm1201_vm5, %v1202_v15, %v1203_v56 }
  0xe9   : > { %v1207_v11 = vsel %vm1201_vm5, %v1205_v5, %v1206_v58  ;;  %v1210_v59 = vsel %vm1201_vm5, %v1208_v54, %v1209_v1  ;;  %v1261_v55 = vlaneseq }
  0xea   : > { %v1192_v44 = vadd.f32 %v1186_v14, %v1155_v57  ;;  %v1193_v0 = vadd.f32 %v1187_v7, %v1156_v41  ;;  %v1194_v12 = vadd.f32 %v1188_v8, %v1157_v3 }
  0xeb   : > { %vm1263_vm6 = vcmp.lt.s32.totalorder %v1261_v55, 384 }
  0xec   : > { %v1214_v48 = vadd.f32 %v1204_v9, %v1192_v44  ;;  %v1215_v42 = vadd.f32 %v1207_v11, %v1193_v0  ;;  %v1216_v45 = vadd.f32 %v1210_v59, %v1194_v12 }
  0xee   : > { %v1226_v13 = vadd.f32 %v1220_v2, %v1214_v48  ;;  %v1227_v6 = vadd.f32 %v1221_v43, %v1215_v42  ;;  %v1228_v40 = vadd.f32 %v1222_v38, %v1216_v45 }
  0xf0   : > { %v1229_v51 = vmax.f32 %v1226_v13, 0.0  ;;  %v1230_v28 = vmax.f32 %v1227_v6, 0.0  ;;  %v1231_v31 = vmax.f32 %v1228_v40, 0.0 }
  0xf2   : > { %v1235_v46 = vrot.slane %v1229_v51, 3  ;;  %v1236_v33 = vrot.slane %v1230_v28, 3  ;;  %v1237_v39 = vrot.slane %v1231_v31, 3 }
  0xf4   : > { %1241 = vst [vmem:[#allocation2] sm:$0x7] %v1235_v46 }
  0xf5   : > { %1242 = vst [vmem:[#allocation2 + $0x8] sm:$0x7] %v1236_v33 }
  0xf6   : > { %1243 = vst [vmem:[#allocation2 + $0x10] sm:$0x7] %v1237_v39 }
  0xfd   : > { %v1252_v16 = vld [vmem:[#allocation2] ss:$8 sm:$0x7]  ;;  %v1254_v18 = vld [vmem:[#allocation2 + $0x1] ss:$8 sm:$0x7] }
  0xfe   : > { %v1253_v23 = vmul.f32 %v1343_v36, %v1252_v16  ;;  %v1256_v34 = vld [vmem:[#allocation2 + $0x2] ss:$8 sm:$0x7]  ;;  %v1255_v49 = vmul.f32 %v1344_v25, %v1254_v18 }
  0xff   : > { %v1257_v53 = vmul.f32 %v1345_v32, %v1256_v34 }
 0x101   : > { %v1258_v35 = vadd.f32 %v1257_v53, %v1253_v23 }
 0x103   : > { %v1259_v61 = vadd.f32 %v1258_v35, %v1255_v49 }
 0x105   : > { %v1260_v47 = vadd.f32 %v1346_v19, %v1259_v61 }
 0x107   : > { %1265 = vst.msk [vmem:[%s172_s24] sm:$0x7] %vm1263_vm6, %v1260_v47 }
 0x108 PF: > { %p9_p9 = scmp.ge.s32.totalorder %s1432_s13, 5   ;;  %s2153_s9 = smov %s1394_s10 }
 0x109   : > { %s2154_s10 = smov %s1441_s16  ;;  %s2155_s11 = smov %s1432_s13 }
 0x10a   :  { %11 = sbr.rel (!%p9_p9) target bundleno = 2 (0x2), region = 109 }

</bundles_post_ra>
